<compile_context>
chip_gen: v7x
topology: tpu7x:2x2x1
jax: 0.10.0
libtpu: 0.0.40
codegen_flags: <defaults>
</compile_context>

<pallas_src>
import jax
import jax.numpy as jnp
import numpy as np
from jax import lax
from jax.experimental import pallas as pl
from jax.experimental.pallas import tpu as pltpu

# ---- problem sizes (small, consistent with the module's forward) -----------
N = 8      # nodes
E = 32     # edges
A = 4      # node-attr (one-hot species) dim
C = 32     # node feature channels
L = 16     # edge-attr (spherical-harmonic-like) dim
R = 8      # radial basis size
M = 64     # radial MLP hidden width
H = 32     # hidden / target channels
TE = E     # edge tile = all edges -> grid of 1 at toy size
AVG_NUM_NEIGHBORS = 4.0
SKIP_SCALE = 1.0 / np.sqrt(A * C)   # e3nn-style path normalization, folded in

_HIGHEST = lax.Precision.HIGHEST


def _block_expand_mask(rows, block):
    """Host-side constant: M[r, j] = 1 iff j // block == r.  Shape (rows, rows*block)."""
    m = np.zeros((rows, rows * block), np.float32)
    for r in range(rows):
        m[r, r * block:(r + 1) * block] = 1.0
    return jnp.asarray(m)


# ---------------------------------------------------------------------------
# Single fused kernel.
#   grid = (E // TE,), output blocks constant across the grid (accumulator).
# ---------------------------------------------------------------------------
def _interaction_kernel(edges_ref, ea_ref, ef_ref,              # per-edge tile
                        feats_ref, attrs_ref,                   # node inputs
                        expa_ref, expl_ref,                     # hoisted 0/1 masks
                        wup_ref, wskip_ref, w1_ref, w2_ref, wlin_ref,  # weights
                        out_ref, sc_ref,                        # outputs
                        h_sc, acc_sc):                          # VMEM scratch
    i = pl.program_id(0)

    # ---- one-time node-side work: linear_up + skip tensor product ----------
    @pl.when(i == 0)
    def _init():
        feats = feats_ref[...]                                  # (N, C) f32
        attrs = attrs_ref[...]                                  # (N, A) f32
        h_sc[...] = jnp.dot(feats, wup_ref[...],
                            preferred_element_type=jnp.float32)
        # skip TP as one K = A*C matmul: x[n, a*C+c] = attrs[n,a] * feats[n,c]
        attrs_full = jnp.dot(attrs, expa_ref[...],              # (N, A*C): attrs[n, j//C]
                             precision=_HIGHEST,
                             preferred_element_type=jnp.float32)
        feats_full = jnp.concatenate([feats] * A, axis=1)       # (N, A*C): feats[n, j%C]
        sc_ref[...] = jnp.dot(attrs_full * feats_full, wskip_ref[...],
                              preferred_element_type=jnp.float32) * SKIP_SCALE
        acc_sc[...] = jnp.zeros_like(acc_sc)

    # ---- radial MLP (fused): per-edge tensor-product weights ----------------
    hidden = jax.nn.silu(jnp.dot(ef_ref[...], w1_ref[...],
                                 preferred_element_type=jnp.float32))
    tpw = jnp.dot(hidden.astype(jnp.bfloat16), w2_ref[...],
                  preferred_element_type=jnp.float32)           # (TE, L*C) f32

    # ---- fold edge_attrs into tpw early (fewer live (TE, L*C) temporaries) --
    ea_full = jnp.dot(ea_ref[...], expl_ref[...],               # (TE, L*C): ea[e, j//C]
                      precision=_HIGHEST,
                      preferred_element_type=jnp.float32)
    tpw = tpw * ea_full

    # ---- gather h[sender] via one-hot matmul (lane-dense edge ids) ----------
    edges = edges_ref[...]                                      # (2, TE) int32
    send = edges[0:1, :]                                        # (1, TE) sublane slice
    recv = edges[1:2, :]                                        # (1, TE)
    node_ids = lax.broadcasted_iota(jnp.int32, (N, TE), 0)
    oh_s = (node_ids == send).astype(jnp.float32)               # (N, TE)
    oh_r = (node_ids == recv).astype(jnp.float32)               # (N, TE)
    h_s = lax.dot_general(oh_s, h_sc[...], (((0,), (0,)), ((), ())),
                          precision=_HIGHEST,
                          preferred_element_type=jnp.float32)   # (TE, C)

    # ---- weighted tensor product, lane-dense over L*C lanes -----------------
    hs_full = jnp.concatenate([h_s] * L, axis=1)                # (TE, L*C): h_s[e, j%C]
    mji = tpw * hs_full                                         # (TE, L*C) f32

    # ---- scatter-sum over receivers: one matmul + full-block accumulate -----
    acc_sc[...] += jnp.dot(oh_r, mji, precision=_HIGHEST,
                           preferred_element_type=jnp.float32)  # (N, L*C)

    # ---- finalize: output linear / avg_num_neighbors ------------------------
    @pl.when(i == pl.num_programs(0) - 1)
    def _finalize():
        out_ref[...] = (jnp.dot(acc_sc[...].astype(jnp.bfloat16), wlin_ref[...],
                                preferred_element_type=jnp.float32)
                        * (1.0 / AVG_NUM_NEIGHBORS))


def interaction_block(node_attrs, node_feats, edge_attrs, edge_feats,
                      edge_index, params):
    w_up, w_skip, w1, w2, w_lin = params
    # Large / streamed operands in bf16: VMEM residency and HBM DMA bytes
    # halve; MXU default precision truncates operands to bf16 anyway.
    w1_b = w1.astype(jnp.bfloat16)
    w2_b = w2.astype(jnp.bfloat16)
    w_lin_b = w_lin.astype(jnp.bfloat16)
    ef_b = edge_feats.astype(jnp.bfloat16)
    edges = edge_index.astype(jnp.int32)          # native (2, E): lane-dense rows
    exp_a = _block_expand_mask(A, C)              # hoisted constant masks
    exp_l = _block_expand_mask(L, C)

    out, sc = pl.pallas_call(
        _interaction_kernel,
        out_shape=(jax.ShapeDtypeStruct((N, H), jnp.float32),
                   jax.ShapeDtypeStruct((N, H), jnp.float32)),
        grid_spec=pltpu.PrefetchScalarGridSpec(
            num_scalar_prefetch=0,
            grid=(E // TE,),
            in_specs=[
                pl.BlockSpec((2, TE), lambda i: (0, i)),        # edge_index (send|recv rows)
                pl.BlockSpec((TE, L), lambda i: (i, 0)),        # edge_attrs
                pl.BlockSpec((TE, R), lambda i: (i, 0)),        # edge_feats (bf16)
                pl.BlockSpec((N, C), lambda i: (0, 0)),         # node_feats (resident)
                pl.BlockSpec((N, A), lambda i: (0, 0)),         # node_attrs (resident)
                pl.BlockSpec((A, A * C), lambda i: (0, 0)),     # attrs block-expand mask
                pl.BlockSpec((L, L * C), lambda i: (0, 0)),     # edge-attr block-expand mask
                pl.BlockSpec((C, C), lambda i: (0, 0)),         # w_up
                pl.BlockSpec((A * C, H), lambda i: (0, 0)),     # w_skip
                pl.BlockSpec((R, M), lambda i: (0, 0)),         # w1 (bf16)
                pl.BlockSpec((M, L * C), lambda i: (0, 0)),     # w2 (bf16)
                pl.BlockSpec((L * C, H), lambda i: (0, 0)),     # w_lin (bf16)
            ],
            out_specs=(pl.BlockSpec((N, H), lambda i: (0, 0)),
                       pl.BlockSpec((N, H), lambda i: (0, 0))),
            scratch_shapes=[pltpu.VMEM((N, C), jnp.float32),        # h = linear_up
                            pltpu.VMEM((N, L * C), jnp.float32)]),  # message accumulator
        compiler_params=pltpu.CompilerParams(
            dimension_semantics=("arbitrary",)),
    )(edges, edge_attrs, ef_b, node_feats, node_attrs,
      exp_a, exp_l, w_up, w_skip, w1_b, w2_b, w_lin_b)
    return out, sc


# ---------------------------------------------------------------------------
# pure-JAX reference for verification
# ---------------------------------------------------------------------------
def interaction_block_ref(node_attrs, node_feats, edge_attrs, edge_feats,
                          edge_index, params):
    w_up, w_skip, w1, w2, w_lin = params
    send, recv = edge_index[0], edge_index[1]
    h = node_feats @ w_up
    sc = jnp.einsum('na,nc,ach->nh', node_attrs, node_feats,
                    w_skip.reshape(A, C, H)) * SKIP_SCALE
    tpw = (jax.nn.silu(edge_feats @ w1) @ w2).reshape(E, L, C)
    mji = tpw * edge_attrs[:, :, None] * h[send][:, None, :]
    msg = jnp.zeros((N, L, C), jnp.float32).at[recv].add(mji)
    out = (msg.reshape(N, L * C) @ w_lin) / AVG_NUM_NEIGHBORS
    return out, sc


if __name__ == "__main__":
    key = jax.random.PRNGKey(0)
    ks = jax.random.split(key, 10)
    node_attrs = jax.nn.one_hot(jax.random.randint(ks[0], (N,), 0, A), A,
                                dtype=jnp.float32)
    node_feats = jax.random.normal(ks[1], (N, C), jnp.float32)
    edge_attrs = jax.random.normal(ks[2], (E, L), jnp.float32)
    edge_feats = jax.random.normal(ks[3], (E, R), jnp.float32)
    edge_index = jax.random.randint(ks[4], (2, E), 0, N, dtype=jnp.int32)

    # deterministic synthetic parameters (shapes implied by the module)
    w_up = jax.random.normal(ks[5], (C, C), jnp.float32) / np.sqrt(C)
    w_skip = jax.random.normal(ks[6], (A * C, H), jnp.float32)
    w1 = jax.random.normal(ks[7], (R, M), jnp.float32) / np.sqrt(R)
    w2 = jax.random.normal(ks[8], (M, L * C), jnp.float32) / np.sqrt(M)
    w_lin = jax.random.normal(ks[9], (L * C, H), jnp.float32) / np.sqrt(L * C)
    params = (w_up, w_skip, w1, w2, w_lin)

    out, sc = jax.block_until_ready(
        interaction_block(node_attrs, node_feats, edge_attrs, edge_feats,
                          edge_index, params))
    out_ref, sc_ref = interaction_block_ref(node_attrs, node_feats, edge_attrs,
                                            edge_feats, edge_index, params)
    # Tolerance accommodates bf16-stored weights + default MXU precision on the
    # weight matmuls (reference is f32 / XLA-default on both paths).
    np.testing.assert_allclose(np.asarray(out), np.asarray(out_ref),
                               rtol=2e-2, atol=2e-2)
    np.testing.assert_allclose(np.asarray(sc), np.asarray(sc_ref),
                               rtol=2e-2, atol=2e-2)
    print("KERNEL_OK")
</pallas_src>

<mosaic_0001>
module attributes {stable_mosaic.version = 11 : i64} {
  func.func @_interaction_kernel(%arg0: i32, %arg1: memref<2x32xi32, #tpu.memory_space<vmem>>, %arg2: memref<32x16xf32, #tpu.memory_space<vmem>>, %arg3: memref<32x8xbf16, #tpu.memory_space<vmem>>, %arg4: memref<8x32xf32, #tpu.memory_space<vmem>>, %arg5: memref<8x4xf32, #tpu.memory_space<vmem>>, %arg6: memref<4x128xf32, #tpu.memory_space<vmem>>, %arg7: memref<16x512xf32, #tpu.memory_space<vmem>>, %arg8: memref<32x32xf32, #tpu.memory_space<vmem>>, %arg9: memref<128x32xf32, #tpu.memory_space<vmem>>, %arg10: memref<8x64xbf16, #tpu.memory_space<vmem>>, %arg11: memref<64x512xbf16, #tpu.memory_space<vmem>>, %arg12: memref<512x32xbf16, #tpu.memory_space<vmem>>, %arg13: memref<8x32xf32, #tpu.memory_space<vmem>>, %arg14: memref<8x32xf32, #tpu.memory_space<vmem>>, %arg15: memref<8x32xf32, #tpu.memory_space<vmem>>, %arg16: memref<8x512xf32, #tpu.memory_space<vmem>>) attributes {dimension_semantics = [#tpu.dimension_semantics<arbitrary>], iteration_bounds = array<i64: 1>, scalar_prefetch = 0 : i64, scratch_operands = 2 : i64, tpu.core_type = #tpu.core_type<tc>, window_params = [{transform_indices = @transform_0, window_bounds = array<i64: 2, 32>}, {transform_indices = @transform_1, window_bounds = array<i64: 32, 16>}, {transform_indices = @transform_2, window_bounds = array<i64: 32, 8>}, {pipeline_mode = #tpu.pipeline_mode<synchronous>, transform_indices = @transform_3, window_bounds = array<i64: 8, 32>}, {pipeline_mode = #tpu.pipeline_mode<synchronous>, transform_indices = @transform_4, window_bounds = array<i64: 8, 4>}, {pipeline_mode = #tpu.pipeline_mode<synchronous>, transform_indices = @transform_5, window_bounds = array<i64: 4, 128>}, {pipeline_mode = #tpu.pipeline_mode<synchronous>, transform_indices = @transform_6, window_bounds = array<i64: 16, 512>}, {pipeline_mode = #tpu.pipeline_mode<synchronous>, transform_indices = @transform_7, window_bounds = array<i64: 32, 32>}, {pipeline_mode = #tpu.pipeline_mode<synchronous>, transform_indices = @transform_8, window_bounds = array<i64: 128, 32>}, {pipeline_mode = #tpu.pipeline_mode<synchronous>, transform_indices = @transform_9, window_bounds = array<i64: 8, 64>}, {pipeline_mode = #tpu.pipeline_mode<synchronous>, transform_indices = @transform_10, window_bounds = array<i64: 64, 512>}, {pipeline_mode = #tpu.pipeline_mode<synchronous>, transform_indices = @transform_11, window_bounds = array<i64: 512, 32>}, {pipeline_mode = #tpu.pipeline_mode<synchronous>, transform_indices = @transform_12, window_bounds = array<i64: 8, 32>}, {pipeline_mode = #tpu.pipeline_mode<synchronous>, transform_indices = @transform_13, window_bounds = array<i64: 8, 32>}]} {
    %c0_i32 = arith.constant 0 : i32
    %0 = arith.cmpi eq, %arg0, %c0_i32 : i32
    %1 = arith.extui %0 : i1 to i32
    %c0_i32_0 = arith.constant 0 : i32
    %2 = arith.cmpi ne, %1, %c0_i32_0 : i32
    scf.if %2 {
      %c0_25 = arith.constant 0 : index
      %c0_26 = arith.constant 0 : index
      %42 = vector.load %arg4[%c0_25, %c0_26] : memref<8x32xf32, #tpu.memory_space<vmem>>, vector<8x32xf32>
      %c0_27 = arith.constant 0 : index
      %c0_28 = arith.constant 0 : index
      %43 = vector.load %arg5[%c0_27, %c0_28] : memref<8x4xf32, #tpu.memory_space<vmem>>, vector<8x4xf32>
      %c0_29 = arith.constant 0 : index
      %c0_30 = arith.constant 0 : index
      %44 = vector.load %arg8[%c0_29, %c0_30] : memref<32x32xf32, #tpu.memory_space<vmem>>, vector<32x32xf32>
      %cst_31 = arith.constant dense<0.000000e+00> : vector<8x32xf32>
      %45 = tpu.matmul %42, %44, %cst_31 {dimension_numbers = #tpu.dot_dimension_numbers<[1], [0], [0], [1], [0, 0, 1, 1], [], []>} : vector<8x32xf32>, vector<32x32xf32>, vector<8x32xf32> -> vector<8x32xf32>
      %c0_32 = arith.constant 0 : index
      %c0_33 = arith.constant 0 : index
      %46 = vector.load %arg15[%c0_32, %c0_33] : memref<8x32xf32, #tpu.memory_space<vmem>>, vector<8x32xf32>
      tpu.vector_store %arg15[%c0_32, %c0_33], %45 {strides = array<i32>} : memref<8x32xf32, #tpu.memory_space<vmem>>, vector<8x32xf32>,
      %c0_34 = arith.constant 0 : index
      %c0_35 = arith.constant 0 : index
      %47 = vector.load %arg6[%c0_34, %c0_35] : memref<4x128xf32, #tpu.memory_space<vmem>>, vector<4x128xf32>
      %cst_36 = arith.constant dense<0.000000e+00> : vector<8x128xf32>
      %48 = tpu.matmul %43, %47, %cst_36 {dimension_numbers = #tpu.dot_dimension_numbers<[1], [0], [0], [1], [0, 0, 1, 1], [], []>, precision = #tpu.contract_precision<fp32>} : vector<8x4xf32>, vector<4x128xf32>, vector<8x128xf32> -> vector<8x128xf32>
      %49 = tpu.concatenate %42, %42, %42, %42 in 1 : vector<8x32xf32>, vector<8x32xf32>, vector<8x32xf32>, vector<8x32xf32> -> vector<8x128xf32>
      %50 = arith.mulf %48, %49 : vector<8x128xf32>
      %c0_37 = arith.constant 0 : index
      %c0_38 = arith.constant 0 : index
      %51 = vector.load %arg9[%c0_37, %c0_38] : memref<128x32xf32, #tpu.memory_space<vmem>>, vector<128x32xf32>
      %cst_39 = arith.constant dense<0.000000e+00> : vector<8x32xf32>
      %52 = tpu.matmul %50, %51, %cst_39 {dimension_numbers = #tpu.dot_dimension_numbers<[1], [0], [0], [1], [0, 0, 1, 1], [], []>} : vector<8x128xf32>, vector<128x32xf32>, vector<8x32xf32> -> vector<8x32xf32>
      %cst_40 = arith.constant 0.0883883461 : f32
      %53 = vector.broadcast %cst_40 : f32 to vector<8x32xf32>
      %54 = arith.mulf %52, %53 : vector<8x32xf32>
      %c0_41 = arith.constant 0 : index
      %c0_42 = arith.constant 0 : index
      %55 = vector.load %arg14[%c0_41, %c0_42] : memref<8x32xf32, #tpu.memory_space<vmem>>, vector<8x32xf32>
      tpu.vector_store %arg14[%c0_41, %c0_42], %54 {strides = array<i32>} : memref<8x32xf32, #tpu.memory_space<vmem>>, vector<8x32xf32>,
      %cst_43 = arith.constant 0.000000e+00 : f32
      %56 = vector.broadcast %cst_43 : f32 to vector<8x512xf32>
      %c0_44 = arith.constant 0 : index
      %c0_45 = arith.constant 0 : index
      %57 = vector.load %arg16[%c0_44, %c0_45] : memref<8x512xf32, #tpu.memory_space<vmem>>, vector<8x512xf32>
      tpu.vector_store %arg16[%c0_44, %c0_45], %56 {strides = array<i32>} : memref<8x512xf32, #tpu.memory_space<vmem>>, vector<8x512xf32>,
    } else {
    }
    %c0 = arith.constant 0 : index
    %c0_1 = arith.constant 0 : index
    %3 = vector.load %arg3[%c0, %c0_1] : memref<32x8xbf16, #tpu.memory_space<vmem>>, vector<32x8xbf16>
    %c0_2 = arith.constant 0 : index
    %c0_3 = arith.constant 0 : index
    %4 = vector.load %arg10[%c0_2, %c0_3] : memref<8x64xbf16, #tpu.memory_space<vmem>>, vector<8x64xbf16>
    %cst = arith.constant dense<0.000000e+00> : vector<32x64xf32>
    %5 = tpu.matmul %3, %4, %cst {dimension_numbers = #tpu.dot_dimension_numbers<[1], [0], [0], [1], [0, 0, 1, 1], [], []>} : vector<32x8xbf16>, vector<8x64xbf16>, vector<32x64xf32> -> vector<32x64xf32>
    %6 = arith.negf %5 : vector<32x64xf32>
    %7 = math.exp %6 : vector<32x64xf32>
    %cst_4 = arith.constant 1.000000e+00 : f32
    %8 = vector.broadcast %cst_4 : f32 to vector<32x64xf32>
    %9 = arith.addf %8, %7 : vector<32x64xf32>
    %10 = arith.divf %8, %9 : vector<32x64xf32>
    %11 = arith.mulf %5, %10 : vector<32x64xf32>
    %12 = arith.truncf %11 : vector<32x64xf32> to vector<32x64xbf16>
    %c0_5 = arith.constant 0 : index
    %c0_6 = arith.constant 0 : index
    %13 = vector.load %arg11[%c0_5, %c0_6] : memref<64x512xbf16, #tpu.memory_space<vmem>>, vector<64x512xbf16>
    %cst_7 = arith.constant dense<0.000000e+00> : vector<32x512xf32>
    %14 = tpu.matmul %12, %13, %cst_7 {dimension_numbers = #tpu.dot_dimension_numbers<[1], [0], [0], [1], [0, 0, 1, 1], [], []>} : vector<32x64xbf16>, vector<64x512xbf16>, vector<32x512xf32> -> vector<32x512xf32>
    %c0_8 = arith.constant 0 : index
    %c0_9 = arith.constant 0 : index
    %15 = vector.load %arg2[%c0_8, %c0_9] : memref<32x16xf32, #tpu.memory_space<vmem>>, vector<32x16xf32>
    %c0_10 = arith.constant 0 : index
    %c0_11 = arith.constant 0 : index
    %16 = vector.load %arg7[%c0_10, %c0_11] : memref<16x512xf32, #tpu.memory_space<vmem>>, vector<16x512xf32>
    %cst_12 = arith.constant dense<0.000000e+00> : vector<32x512xf32>
    %17 = tpu.matmul %15, %16, %cst_12 {dimension_numbers = #tpu.dot_dimension_numbers<[1], [0], [0], [1], [0, 0, 1, 1], [], []>, precision = #tpu.contract_precision<fp32>} : vector<32x16xf32>, vector<16x512xf32>, vector<32x512xf32> -> vector<32x512xf32>
    %18 = arith.mulf %14, %17 : vector<32x512xf32>
    %c0_13 = arith.constant 0 : index
    %c0_14 = arith.constant 0 : index
    %19 = vector.load %arg1[%c0_13, %c0_14] : memref<2x32xi32, #tpu.memory_space<vmem>>, vector<2x32xi32>
    %20 = vector.extract_strided_slice %19 {offsets = [0, 0], sizes = [1, 32], strides = [1, 1]} : vector<2x32xi32> to vector<1x32xi32>
    %21 = vector.extract_strided_slice %19 {offsets = [1, 0], sizes = [1, 32], strides = [1, 1]} : vector<2x32xi32> to vector<1x32xi32>
    %22 = tpu.iota {dimensions = array<i32: 0>} : vector<8x32xi32>
    %23 = vector.broadcast %20 : vector<1x32xi32> to vector<8x32xi32>
    %24 = arith.cmpi eq, %22, %23 : vector<8x32xi32>
    %25 = arith.extui %24 : vector<8x32xi1> to vector<8x32xi32>
    %26 = arith.sitofp %25 : vector<8x32xi32> to vector<8x32xf32>
    %27 = vector.broadcast %21 : vector<1x32xi32> to vector<8x32xi32>
    %28 = arith.cmpi eq, %22, %27 : vector<8x32xi32>
    %29 = arith.extui %28 : vector<8x32xi1> to vector<8x32xi32>
    %30 = arith.sitofp %29 : vector<8x32xi32> to vector<8x32xf32>
    %c0_15 = arith.constant 0 : index
    %c0_16 = arith.constant 0 : index
    %31 = vector.load %arg15[%c0_15, %c0_16] : memref<8x32xf32, #tpu.memory_space<vmem>>, vector<8x32xf32>
    %cst_17 = arith.constant dense<0.000000e+00> : vector<32x32xf32>
    %32 = tpu.matmul %26, %31, %cst_17 {dimension_numbers = #tpu.dot_dimension_numbers<[0], [0], [1], [1], [0, 1, 1, 1], [], []>, precision = #tpu.contract_precision<fp32>} : vector<8x32xf32>, vector<8x32xf32>, vector<32x32xf32> -> vector<32x32xf32>
    %33 = tpu.concatenate %32, %32, %32, %32, %32, %32, %32, %32, %32, %32, %32, %32, %32, %32, %32, %32 in 1 : vector<32x32xf32>, vector<32x32xf32>, vector<32x32xf32>, vector<32x32xf32>, vector<32x32xf32>, vector<32x32xf32>, vector<32x32xf32>, vector<32x32xf32>, vector<32x32xf32>, vector<32x32xf32>, vector<32x32xf32>, vector<32x32xf32>, vector<32x32xf32>, vector<32x32xf32>, vector<32x32xf32>, vector<32x32xf32> -> vector<32x512xf32>
    %34 = arith.mulf %18, %33 : vector<32x512xf32>
    %c0_18 = arith.constant 0 : index
    %c0_19 = arith.constant 0 : index
    %35 = vector.load %arg16[%c0_18, %c0_19] : memref<8x512xf32, #tpu.memory_space<vmem>>, vector<8x512xf32>
    %cst_20 = arith.constant dense<0.000000e+00> : vector<8x512xf32>
    %36 = tpu.matmul %30, %34, %cst_20 {dimension_numbers = #tpu.dot_dimension_numbers<[1], [0], [0], [1], [0, 0, 1, 1], [], []>, precision = #tpu.contract_precision<fp32>} : vector<8x32xf32>, vector<32x512xf32>, vector<8x512xf32> -> vector<8x512xf32>
    %37 = arith.addf %35, %36 : vector<8x512xf32>
    %c0_21 = arith.constant 0 : index
    %c0_22 = arith.constant 0 : index
    %38 = vector.load %arg16[%c0_21, %c0_22] : memref<8x512xf32, #tpu.memory_space<vmem>>, vector<8x512xf32>
    tpu.vector_store %arg16[%c0_21, %c0_22], %37 {strides = array<i32>} : memref<8x512xf32, #tpu.memory_space<vmem>>, vector<8x512xf32>,
    %c0_i32_23 = arith.constant 0 : i32
    %39 = arith.cmpi eq, %arg0, %c0_i32_23 : i32
    %40 = arith.extui %39 : i1 to i32
    %c0_i32_24 = arith.constant 0 : i32
    %41 = arith.cmpi ne, %40, %c0_i32_24 : i32
    scf.if %41 {
      %c0_25 = arith.constant 0 : index
      %c0_26 = arith.constant 0 : index
      %42 = vector.load %arg16[%c0_25, %c0_26] : memref<8x512xf32, #tpu.memory_space<vmem>>, vector<8x512xf32>
      %43 = arith.truncf %42 : vector<8x512xf32> to vector<8x512xbf16>
      %c0_27 = arith.constant 0 : index
      %c0_28 = arith.constant 0 : index
      %44 = vector.load %arg12[%c0_27, %c0_28] : memref<512x32xbf16, #tpu.memory_space<vmem>>, vector<512x32xbf16>
      %cst_29 = arith.constant dense<0.000000e+00> : vector<8x32xf32>
      %45 = tpu.matmul %43, %44, %cst_29 {dimension_numbers = #tpu.dot_dimension_numbers<[1], [0], [0], [1], [0, 0, 1, 1], [], []>} : vector<8x512xbf16>, vector<512x32xbf16>, vector<8x32xf32> -> vector<8x32xf32>
      %cst_30 = arith.constant 2.500000e-01 : f32
      %46 = vector.broadcast %cst_30 : f32 to vector<8x32xf32>
      %47 = arith.mulf %45, %46 : vector<8x32xf32>
      %c0_31 = arith.constant 0 : index
      %c0_32 = arith.constant 0 : index
      %48 = vector.load %arg13[%c0_31, %c0_32] : memref<8x32xf32, #tpu.memory_space<vmem>>, vector<8x32xf32>
      tpu.vector_store %arg13[%c0_31, %c0_32], %47 {strides = array<i32>} : memref<8x32xf32, #tpu.memory_space<vmem>>, vector<8x32xf32>,
    } else {
    }
    return
  }
  func.func @transform_0(%arg0: i32) -> (i32, i32) {
    %c0_i32 = arith.constant 0 : i32
    %c0_i32_0 = arith.constant 0 : i32
    return %c0_i32, %arg0 : i32, i32
  }
  func.func @transform_1(%arg0: i32) -> (i32, i32) {
    %c0_i32 = arith.constant 0 : i32
    %c0_i32_0 = arith.constant 0 : i32
    return %arg0, %c0_i32 : i32, i32
  }
  func.func @transform_2(%arg0: i32) -> (i32, i32) {
    %c0_i32 = arith.constant 0 : i32
    %c0_i32_0 = arith.constant 0 : i32
    return %arg0, %c0_i32 : i32, i32
  }
  func.func @transform_3(%arg0: i32) -> (i32, i32) {
    %c0_i32 = arith.constant 0 : i32
    %c0_i32_0 = arith.constant 0 : i32
    %c0_i32_1 = arith.constant 0 : i32
    return %c0_i32, %c0_i32_0 : i32, i32
  }
  func.func @transform_4(%arg0: i32) -> (i32, i32) {
    %c0_i32 = arith.constant 0 : i32
    %c0_i32_0 = arith.constant 0 : i32
    %c0_i32_1 = arith.constant 0 : i32
    return %c0_i32, %c0_i32_0 : i32, i32
  }
  func.func @transform_5(%arg0: i32) -> (i32, i32) {
    %c0_i32 = arith.constant 0 : i32
    %c0_i32_0 = arith.constant 0 : i32
    %c0_i32_1 = arith.constant 0 : i32
    return %c0_i32, %c0_i32_0 : i32, i32
  }
  func.func @transform_6(%arg0: i32) -> (i32, i32) {
    %c0_i32 = arith.constant 0 : i32
    %c0_i32_0 = arith.constant 0 : i32
    %c0_i32_1 = arith.constant 0 : i32
    return %c0_i32, %c0_i32_0 : i32, i32
  }
  func.func @transform_7(%arg0: i32) -> (i32, i32) {
    %c0_i32 = arith.constant 0 : i32
    %c0_i32_0 = arith.constant 0 : i32
    %c0_i32_1 = arith.constant 0 : i32
    return %c0_i32, %c0_i32_0 : i32, i32
  }
  func.func @transform_8(%arg0: i32) -> (i32, i32) {
    %c0_i32 = arith.constant 0 : i32
    %c0_i32_0 = arith.constant 0 : i32
    %c0_i32_1 = arith.constant 0 : i32
    return %c0_i32, %c0_i32_0 : i32, i32
  }
  func.func @transform_9(%arg0: i32) -> (i32, i32) {
    %c0_i32 = arith.constant 0 : i32
    %c0_i32_0 = arith.constant 0 : i32
    %c0_i32_1 = arith.constant 0 : i32
    return %c0_i32, %c0_i32_0 : i32, i32
  }
  func.func @transform_10(%arg0: i32) -> (i32, i32) {
    %c0_i32 = arith.constant 0 : i32
    %c0_i32_0 = arith.constant 0 : i32
    %c0_i32_1 = arith.constant 0 : i32
    return %c0_i32, %c0_i32_0 : i32, i32
  }
  func.func @transform_11(%arg0: i32) -> (i32, i32) {
    %c0_i32 = arith.constant 0 : i32
    %c0_i32_0 = arith.constant 0 : i32
    %c0_i32_1 = arith.constant 0 : i32
    return %c0_i32, %c0_i32_0 : i32, i32
  }
  func.func @transform_12(%arg0: i32) -> (i32, i32) {
    %c0_i32 = arith.constant 0 : i32
    %c0_i32_0 = arith.constant 0 : i32
    %c0_i32_1 = arith.constant 0 : i32
    return %c0_i32, %c0_i32_0 : i32, i32
  }
  func.func @transform_13(%arg0: i32) -> (i32, i32) {
    %c0_i32 = arith.constant 0 : i32
    %c0_i32_0 = arith.constant 0 : i32
    %c0_i32_1 = arith.constant 0 : i32
    return %c0_i32, %c0_i32_0 : i32, i32
  }
}

</mosaic_0001>

<bundles_post_ra>
// kernel: tpu_custom_call.1
= control target key start
LH: loop header
LB: loop body
LE: loop exit
PB: predicated region body
PF: predicated region fallthrough
CT: control target
= control target key end

     0   :  { %19 = vsyncpa [#allocation5], 0  ;;  %vm136_vm0 = vcmask 1043456   ;;  %v5254_v2 = vmov 0.0   ;;  %vm5255_vm1 = vmmov 0   ;;  %vm132_vm2 = vcmask 31744   ;;  %s6232_s0 = inlined_call_operand.vmem [shape: s32[2,32], index: 0, kind: input, shape index: {}]   ;;  %s6233_s1 = inlined_call_operand.vmem [shape: f32[32,16], index: 1, kind: input, shape index: {}]   ;;  %s6234_s2 = inlined_call_operand.vmem [shape: bf16[32,8], index: 2, kind: input, shape index: {}]   ;;  %s6235_s3 = inlined_call_operand.vmem [shape: f32[8,32], index: 3, kind: input, shape index: {}]   ;;  %s6236_s4 = inlined_call_operand.vmem [shape: f32[8,4], index: 4, kind: input, shape index: {}]   ;;  %s6237_s5 = inlined_call_operand.vmem [shape: f32[4,128], index: 5, kind: input, shape index: {}]   ;;  %s6238_s6 = inlined_call_operand.vmem [shape: f32[16,512], index: 6, kind: input, shape index: {}]   ;;  %s6239_s7 = inlined_call_operand.vmem [shape: f32[32,32], index: 7, kind: input, shape index: {}]   ;;  %s6240_s8 = inlined_call_operand.vmem [shape: f32[128,32], index: 8, kind: input, shape index: {}]   ;;  %s6241_s9 = inlined_call_operand.vmem [shape: bf16[8,64], index: 9, kind: input, shape index: {}]   ;;  %s6242_s10 = inlined_call_operand.vmem [shape: bf16[64,512], index: 10, kind: input, shape index: {}]   ;;  %s6243_s11 = inlined_call_operand.vmem [shape: bf16[512,32], index: 11, kind: input, shape index: {}]   ;;  %s6244_s12 = inlined_call_operand.hbm [shape: f32[8,32], index: 12, kind: output, shape index: {0}]   ;;  %s6245_s13 = inlined_call_operand.hbm [shape: f32[8,32], index: 13, kind: output, shape index: {1}]  }
   0x1   :  { %v131_v0 = vld [vmem:[%s6237_s5] sm:$0xf]  ;;  %4705 = vmatprep.subr.mxu1 %v5254_v2  ;;  %4707 = vmatprep.mubr.msk.f32.mxu1 %vm5255_vm1, %v5254_v2  ;;  %v53_v5 = vld [vmem:[%s6239_s7 + $0x8] sm:$0xff]  ;;  %v54_v6 = vld [vmem:[%s6239_s7 + $0x10] sm:$0xff]  ;;  %v2325_v7 = vlaneseq  ;;  %v5256_v10 = vmov 0.0|0.0   ;;  %s5257_s21 = smov 64  }
   0x2   :  { %v51_v1 = vld [vmem:[%s6236_s4] sm:$0xff]  ;;  %v138_v3 = vsel %vm136_vm0, %v131_v0, 0  ;;  %4819 = vmatprep.subr.bf16.mxu0 %v5256_v10  ;;  %v55_v12 = vld [vmem:[%s6239_s7 + $0x18] sm:$0xff]  ;;  %4697 = vmatprep.mubr.msk.f32.mxu0 %vm5255_vm1, %v5254_v2  ;;  %vm56_vm3 = vcmask 261120   ;;  %v602_v29 = vld [vmem:[%s6240_s8 + $0x8] sm:$0xff]  ;;  %s5258_s24 = smov 96  }
   0x3   :  { %v52_v4 = vld [vmem:[%s6239_s7] sm:$0xff]  ;;  %v5352_v8 = vand.u32 4294901760, %v138_v3  ;;  %v134_v9 = vsel %vm132_vm2, %v51_v1, 0  ;;  %v4823_v15 = vpack.c.bf16 %v55_v12, %v54_v6  ;;  %v5372_v18 = vshrl.u32 %v2325_v7, 7  ;;  %v603_v34 = vld [vmem:[%s6240_s8 + $0x10] sm:$0xff]  ;;  %v604_v35 = vld [vmem:[%s6240_s8 + $0x18] sm:$0xff] }
   0x4   :  { %v4820_v11 = vpack.c.bf16 %v53_v5, %v52_v4  ;;  %v5360_v13 = vand.u32 4294901760, %v134_v9  ;;  %v5370_v17 = vld [vmem:[%s6235_s3] sm:$0xff]  ;;  %v606_v37 = vld [vmem:[%s6240_s8 + $0x28] sm:$0xff]  ;;  %v4829_v38 = vpack.c.bf16 %v604_v35, %v603_v34  ;;  %v607_v39 = vld [vmem:[%s6240_s8 + $0x30] sm:$0xff] }
   0x5   :  { %v5363_v14 = vsub.f32 %v138_v3, %v5352_v8  ;;  %v2324_v20 = vld [vmem:[%s6232_s0] sm:$0x3]  ;;  %589 = vrot.lane.b32.xlu1 %v5370_v17, %s5257_s21  ;;  %v2329_v22 = vsub.s32 0, %v5372_v18  ;;  %v2336_v23 = vsub.s32 1, %v5372_v18  ;;  %v608_v40 = vld [vmem:[%s6240_s8 + $0x38] sm:$0xff]  ;;  %v610_v44 = vld [vmem:[%s6240_s8 + $0x48] sm:$0xff] }
   0x6   :  { %4821 = vmatpush3.bf16.msra.mxu0 %v4820_v11  ;;  %v207_v16 = vsub.f32 %v134_v9, %v5360_v13  ;;  %v601_v28 = vld [vmem:[%s6240_s8] sm:$0xff]  ;;  %v4835_v42 = vpack.c.bf16 %v608_v40, %v607_v39  ;;  %v611_v45 = vld [vmem:[%s6240_s8 + $0x50] sm:$0xff]  ;;  %v612_v47 = vld [vmem:[%s6240_s8 + $0x58] sm:$0xff] }
   0x7   :  { %4822 = vmatprep.subr.bf16.mxu0 %v5256_v10  ;;  %v219_v19 = vand.u32 4294901760, %v5363_v14  ;;  %v2330_v26 = vrot.slane %v2324_v20, %v2329_v22  ;;  %v5384_v27 = vrot.slane %v2324_v20, %v2336_v23  ;;  %v4826_v33 = vpack.c.bf16 %v602_v29, %v601_v28  ;;  %v605_v36 = vld [vmem:[%s6240_s8 + $0x20] sm:$0xff] }
   0x8   :  { %v208_v21 = vand.u32 4294901760, %v207_v16  ;;  %v4832_v41 = vpack.c.bf16 %v606_v37, %v605_v36  ;;  %v609_v43 = vld [vmem:[%s6240_s8 + $0x40] sm:$0xff]  ;;  %v4841_v49 = vpack.c.bf16 %v612_v47, %v611_v45 }
   0x9   :  { %v220_v24 = vsub.f32 %v5363_v14, %v219_v19  ;;  %592 = vrot.lane.b32.xlu1 %v5370_v17, %s5258_s24  ;;  %vm2331_vm4 = vcmp.eq.s32.totalorder %v5372_v18, %v2330_v26  ;;  %vm2338_vm5 = vcmp.eq.s32.totalorder %v5372_v18, %v5384_v27  ;;  %v4838_v46 = vpack.c.bf16 %v610_v44, %v609_v43  ;;  %v697_v48 = vld [vmem:[%s6241_s9] sm:$0xf] }
   0xa   :  { %4824 = vmatpush3.bf16.msra.mxu0 %v4823_v15  ;;  %v209_v25 = vsub.f32 %v207_v16, %v208_v21  ;;  %v4538_v32 = vsel %vm2331_vm4, 1.0, %v5254_v2 }
   0xb   :  { %4700 = vmatprep.subr.mxu0 %v5254_v2  ;;  %v221_v30 = vand.u32 4294901760, %v220_v24  ;;  %2342 = vxpose.xlu0.b32.start.end [1/1] (short) (narrow) %v4538_v32, 32 }
   0xc   :  { %v210_v31 = vand.u32 4294901760, %v209_v25 }
   0xd   :  { %4698 = vmatmul.mubr.msk.f32.vlgmr.msra.gmra.mrb[0].mxu0 %vm56_vm3, %v5370_v17  ;;  %4706 = vmatpush3.msra.mxu1 %v221_v30 }
   0xe   :  { %4701 = vmatpush3.msra.mxu0 %v5352_v8  ;;  %4708 = vmatmul.mubr.f32.vlgmr.msra.gmra.mrb[0].mxu1 %v5360_v13 }
   0xf   :  { %4710 = vmatprep.subr.mxu1 %v5254_v2  ;;  %4712 = vmatprep.mubr.msk.f32.mxu1 %vm5255_vm1, %v5254_v2 }
  0x10   :  { %4711 = vmatpush3.msra.mxu1 %v5363_v14  ;;  %4702 = vmatprep.mubr.msk.f32.mxu0 %vm5255_vm1, %v5254_v2 }
  0x11   :  { %4715 = vmatprep.subr.mxu1 %v5254_v2  ;;  %4703 = vmatmul.mubr.f32.vlgmr.msra.gmra.mrb[2].mxu0 %v210_v31 }
  0x12   :  { %4825 = vmatprep.subr.bf16.mxu0 %v5256_v10  ;;  %4762 = vmatprep.mubr.msk.f32.mxu0 %vm5255_vm1, %v5254_v2 }
  0x13   :  { %4827 = vmatpush3.bf16.msra.mxu0 %v4826_v33 }
  0x14   :  { %4828 = vmatprep.subr.bf16.mxu0 %v5256_v10 }
  0x16   :  { %4713 = vmatmul.mubr.f32.vlgmr.msra.gmra.mrb[0].mxu1 %v207_v16 }
  0x17   :  { %4716 = vmatpush3.msra.mxu1 %v5352_v8  ;;  %4717 = vmatprep.mubr.msk.f32.mxu1 %vm5255_vm1, %v5254_v2 }
  0x18   :  { %4720 = vmatprep.subr.mxu1 %v5254_v2  ;;  %4830 = vmatpush3.bf16.msra.mxu0 %v4829_v38 }
  0x19   :  { %4831 = vmatprep.subr.bf16.mxu0 %v5256_v10 }
  0x1c   :  { %4833 = vmatpush3.bf16.msra.mxu0 %v4832_v41 }
  0x1d   :  { %4834 = vmatprep.subr.bf16.mxu0 %v5256_v10 }
  0x1e   :  { %4718 = vmatmul.mubr.f32.vlgmr.msra.gmra.mrb[0].mxu1 %v208_v21 }
  0x1f   :  { %4721 = vmatpush3.msra.mxu1 %v219_v19  ;;  %4722 = vmatprep.mubr.msk.f32.mxu1 %vm5255_vm1, %v5254_v2 }
  0x20   :  { %4725 = vmatprep.subr.mxu1 %v5254_v2  ;;  %4836 = vmatpush3.bf16.msra.mxu0 %v4835_v42 }
  0x21   :  { %4837 = vmatprep.subr.bf16.mxu0 %v5256_v10 }
  0x24   :  { %4839 = vmatpush3.bf16.msra.mxu0 %v4838_v46 }
  0x25   :  { %4840 = vmatprep.subr.bf16.mxu0 %v5256_v10 }
  0x26   :  { %4723 = vmatmul.mubr.f32.vlgmr.msra.gmra.mrb[0].mxu1 %v5360_v13 }
  0x27   :  { %20 = vsyncpa [#allocation7], 0  ;;  %4726 = vmatpush3.msra.mxu1 %v5352_v8  ;;  %4727 = vmatprep.mubr.msk.f32.mxu1 %vm5255_vm1, %v5254_v2  ;;  %v5132_v50 = vld [vmem:[%s6234_s2] sm:$0xff]   ;;  %v717_v51 = vsel %vm136_vm0, %v697_v48, 0  ;;  %vm708_vm6 = vcmask 64512   ;;  %v5133_v52 = vld [vmem:[%s6234_s2 + $0x8] sm:$0xff]  }
  0x28   :  { %5122 = vmatprep.subr.msk.bf16.mxu1 %vm136_vm0, %v697_v48  ;;  %4842 = vmatpush3.bf16.msra.mxu0 %v4841_v49  ;;  %s5259_s30 = smov 32   ;;  %v613_v53 = vld [vmem:[%s6240_s8 + $0x60] sm:$0xff]  ;;  %v614_v54 = vld [vmem:[%s6240_s8 + $0x68] sm:$0xff]  ;;  %v615_v56 = vld [vmem:[%s6240_s8 + $0x70] sm:$0xff]  ;;  %v5260_v22 = vmov 0   ;;  %vm1019_vm7 = vcmask 130048  }
  0x29   :  { %4843 = vmatprep.subr.bf16.mxu0 %v5256_v10  ;;  %v4844_v55 = vpack.c.bf16 %v614_v54, %v613_v53  ;;  %v616_v57 = vld [vmem:[%s6240_s8 + $0x78] sm:$0xff]  ;;  %v5134_v11 = vld [vmem:[%s6242_s10] ss:$16 sps:$4 sm:$0xff]   ;;  %v5139_v12 = vld [vmem:[%s6242_s10 + $0x24] ss:$16 sps:$4 sm:$0xff]   ;;  %vm596_vm8 = vcmask 523264  }
  0x2a   :  { %v4847_v58 = vpack.c.bf16 %v616_v57, %v615_v56  ;;  %v1014_v59 = vld [vmem:[%s6238_s6 + $0x18] sm:$0xff]  ;;  %v5142_v14 = vld [vmem:[%s6242_s10 + $0x44] ss:$16 sps:$4 sm:$0xff]   ;;  %v5140_v15 = vld [vmem:[%s6242_s10 + $0x40] ss:$16 sps:$4 sm:$0xff]   ;;  %vm598_vm9 = vcmask 785408  }
  0x2b   :  { %v1018_v60 = vld [vmem:[%s6238_s6 + $0x38] sm:$0xff]  ;;  %v1670_v61 = vand.u32 4294901760, %v1014_v59  ;;  %v5145_v16 = vld [vmem:[%s6242_s10 + $0x64] ss:$16 sps:$4 sm:$0xff]   ;;  %v5143_v19 = vld [vmem:[%s6242_s10 + $0x60] ss:$16 sps:$4 sm:$0xff]  }
  0x2c   :  { %4845 = vmatpush3.bf16.msra.mxu0 %v4844_v55  ;;  %v1674_v62 = vand.u32 4294901760, %v1018_v60  ;;  %v5148_v21 = vld [vmem:[%s6242_s10 + $0xc] ss:$16 sps:$4 sm:$0xff]   ;;  %v1007_v32 = vld [vmem:[%s6233_s1] sm:$0xff]  ;;  %v1013_v34 = vld [vmem:[%s6238_s6 + $0x10] sm:$0xff]  ;;  %s5261_s29 = smov [#allocation6]  }
  0x2d   :  { %4846 = vmatprep.subr.bf16.mxu0 %v5256_v10  ;;  %v5497_v0 = vsub.f32 %v1014_v59, %v1670_v61  ;;  %v5136_v10 = vld [vmem:[%s6242_s10 + $0x4] ss:$16 sps:$4 sm:$0xff]   ;;  %v1021_v36 = vsel %vm1019_vm7, %v1007_v32, 0  ;;  %v1008_v37 = vld [vmem:[%s6233_s1 + $0x8] sm:$0xff]  ;;  %v1672_v38 = vand.u32 4294901760, %v1013_v34  ;;  %v1010_v53 = vld [vmem:[%s6233_s1 + $0x18] sm:$0xff] }
  0x2e   :  { %4728 = vmatmul.mubr.f32.vlgmr.msra.gmra.mrb[0].mxu1 %v5360_v13  ;;  %v5494_v63 = vpack.c.bf16 %v1674_v62, %v1670_v61  ;;  %v5499_v1 = vsub.f32 %v1018_v60, %v1674_v62  ;;  %v5137_v13 = vld [vmem:[%s6242_s10 + $0x20] ss:$16 sps:$4 sm:$0xff]   ;;  %v5561_v40 = vand.u32 4294901760, %v1021_v36  ;;  %v1024_v43 = vsel %vm1019_vm7, %v1008_v37, 0  ;;  %s4497_s5 = sshll.u32 %s5261_s29, 4  ;;  %s4498_s5 = int_to_ptr.vmem [resolvable:$true] %s4497_s5 }
  0x2f   :  { %4766 = vmatpush3.bf16.msra.mxu1 %v717_v51  ;;  %4767 = vmatprep.mubr.msk.bf16.mxu1 %vm708_vm6, %v5132_v50  ;;  %v1785_v3 = vand.u32 4294901760, %v5497_v0  ;;  %v1017_v35 = vld [vmem:[%s6238_s6 + $0x30] sm:$0xff]  ;;  %v5563_v41 = vsub.f32 %v1013_v34, %v1672_v38  ;;  %v5574_v48 = vand.u32 4294901760, %v1024_v43  ;;  %s5206_s14 = scalar_lea.vmem %s4498_s5, 128  ;;  %p5211_p1 = scmp.lt.s32.totalorder %s4498_s5, %s4498_s5 }
  0x30   :  { %4848 = vmatpush3.bf16.msra.mxu0 %v4847_v58  ;;  %v1797_v4 = vand.u32 4294901760, %v5499_v1  ;;  %901 = vmatprep.subr.bf16.mxu1 %v5136_v10  ;;  %v4881_v20 = vpack.c.bf16 %v5499_v1, %v5497_v0  ;;  %v1676_v39 = vand.u32 4294901760, %v1017_v35  ;;  %v1009_v46 = vld [vmem:[%s6233_s1 + $0x10] sm:$0xff]  ;;  %v5572_v47 = vsub.f32 %v1021_v36, %v5561_v40  ;;  %p5207_p0 = scmp.ne.s32.totalorder %s4498_s5, %s5206_s14  ;;  %p5212_p2 = scmp.lt.s32.totalorder %s5206_s14, %s5206_s14 }
  0x31   :  { %4874 = vmatprep.subr.bf16.mxu0 %v5494_v63  ;;  %v1786_v5 = vsub.f32 %v5497_v0, %v1785_v3  ;;  %v1027_v50 = vsel %vm1019_vm7, %v1009_v46, 0  ;;  %v1791_v51 = vand.u32 4294901760, %v5563_v41  ;;  %v5589_v57 = vsub.f32 %v1024_v43, %v5574_v48 }
  0x32   :  { %4768 = vmatmul.mubr.msk.bf16.vlgmr.msra.gmra.mrb[4].mxu1 %vm708_vm6, %v5133_v52  ;;  %v1798_v6 = vsub.f32 %v5499_v1, %v1797_v4  ;;  %v5537_v23 = vpack.c.bf16 %v1797_v4, %v1785_v3  ;;  %v5565_v42 = vsub.f32 %v1017_v35, %v1676_v39  ;;  %v5585_v54 = vand.u32 4294901760, %v5572_v47  ;;  %p5213_p3 = por %p5212_p2, %p5211_p1 }
  0x33   :  { %v1787_v7 = vand.u32 4294901760, %v1786_v5  ;;  %902 = vmatpush1.bf16.msra.mxu1 %v5134_v11  ;;  %933 = vmatprep.mubr.bf16.mxu1 %v5260_v22  ;;  %v1030_v58 = vsel %vm1019_vm7, %v1010_v53, 0  ;;  %v1792_v59 = vsub.f32 %v5563_v41, %v1791_v51  ;;  %v5611_v10 = vpack.c.bf16 %v1676_v39, %v1672_v38 }
  0x34   :  { %v1799_v8 = vand.u32 4294901760, %v1798_v6  ;;  %903 = vmatprep.subr.bf16.mxu1 %v5139_v12  ;;  %v1803_v52 = vand.u32 4294901760, %v5565_v42  ;;  %v1104_v3 = vsub.f32 %v5572_v47, %v5585_v54  ;;  %v5604_v6 = vand.u32 4294901760, %v5589_v57  ;;  %p5214_p4 = pnand %p5213_p3, %p5207_p0 }
  0x35   :  { %v1793_v11 = vand.u32 4294901760, %v1792_v59  ;;  %v1012_v59 = vld [vmem:[%s6238_s6 + $0x8] sm:$0xff] }
  0x36   :  { %v5505_v9 = vpack.c.bf16 %v1799_v8, %v1787_v7  ;;  %v1804_v60 = vsub.f32 %v5565_v42, %v1803_v52  ;;  %v5609_v8 = vand.u32 4294901760, %v1030_v58 }
  0x37   :  { %904 = vmatpush1.bf16.msra.mxu1 %v5137_v13 }
  0x38   :  { %905 = vmatprep.subr.bf16.mxu1 %v5142_v14  ;;  %v1805_v12 = vand.u32 4294901760, %v1804_v60  ;;  %v1016_v60 = vld [vmem:[%s6238_s6 + $0x28] sm:$0xff] }
  0x3a   :  { %v4879_v32 = vpack.c.bf16 %v1805_v12, %v1793_v11  ;;  %v1032_v12 = vand.u32 4294901760, %v1012_v59 }
  0x3b   :  { %906 = vmatpush1.bf16.msra.mxu1 %v5140_v15  ;;  %v5613_v15 = vand.u32 4294901760, %v1104_v3 }
  0x3c   :  { %907 = vmatprep.subr.bf16.mxu1 %v5145_v16 }
  0x3f   :  { %908 = vmatpush1.bf16.msra.mxu1 %v5143_v19 }
  0x40   :  { %586 = vrot.lane.b32.xlu0 %v5370_v17, %s5259_s30  ;;  %954 = vmatprep.subr.bf16.mxu1 %v5148_v21  ;;  %v1115_v21 = vsub.f32 %v5589_v57, %v5604_v6 }
  0x42   :  { %v5627_v37 = vand.u32 4294901760, %v1115_v21  ;;  %v5146_v21 = vld [vmem:[%s6242_s10 + $0x8] ss:$16 sps:$4 sm:$0xff]  }
  0x77   :  { %v590_v44 = vpop.permute.xlu1 %589 }
  0x7b   :  { %v593_v55 = vpop.permute.xlu1 %592 }
  0x8b   :  { %v5539_v25 = vpop.trf.xlu0 }
  0x8f   :  { %v5542_v30 = vpop.trf.xlu0 }
  0x93   :  { %v5544_v31 = vpop.trf.xlu0 }
  0x97   :  { %v5549_v33 = vpop.trf.xlu0 }
  0xb2   :  { %v587_v45 = vpop.permute.xlu0 %586 }
  0xb3   :  { %v595_v49 = vsel %vm56_vm3, %v5370_v17, %v587_v45  ;;  %v5591_v17 = vand.u32 4294901760, %v1027_v50 }
  0xb4   :  { %v597_v56 = vsel %vm596_vm8, %v595_v49, %v590_v44 }
  0xb5   :  { %v599_v62 = vsel %vm598_vm9, %v597_v56, %v593_v55  ;;  %v5607_v7 = vsub.f32 %v1027_v50, %v5591_v17  ;;  %v4883_v55 = vpack.c.bf16 %v5565_v42, %v5563_v41 }
  0xe0   :  { %v126_v24 = vpop.f32.mrb[0].mxu0 }
  0xe1   :  { %130 = vst.msk [vmem:[#allocation2] sm:$0xff] %vm56_vm3, %v126_v24  ;;  %v4699_v26 = vpop.f32.mrb[1].mxu0  ;;  %v5618_v24 = vand.u32 4294901760, %v5607_v7 }
  0xe2   :  { %v5621_v26 = vsub.f32 %v1030_v58, %v5609_v8 }
  0xe3   :  { %v1126_v38 = vsub.f32 %v5607_v7, %v5618_v24 }
  0xe4   :  { %v212_v28 = vpop.f32.mrb[2].mxu0  ;;  %v5632_v39 = vand.u32 4294901760, %v5621_v26 }
  0xe5   :  { %v4704_v29 = vpop.f32.mrb[3].mxu0 }
  0xe6   :  { %v1137_v43 = vsub.f32 %v5621_v26, %v5632_v39 }
  0xe8   :  { %v5645_v45 = vand.u32 4294901760, %v1137_v43  ;;  %v5157_v43 = vld [vmem:[%s6242_s10 + $0x6c] ss:$16 sps:$4 sm:$0xff]  }
 0x101   :  { %v582_v61 = vpop.f32.mrb[0].mxu1 }
 0x102   :  { %v4993_v4 = vadd.f32 %v582_v61, %v212_v28  ;;  %v4729_v5 = vpop.f32.mrb[1].mxu1 }
 0x104   :  { %v600_v13 = vmul.f32 %v4993_v4, %v599_v62 }
 0x105   :  { %v4769_v14 = vpop.f32.mrb[4].mxu1 }
 0x106   :  { %v4516_v16 = vmul.f32 -1.442695, %v4769_v14  ;;  %4763 = vmatmul.mubr.f32.vlgmr.msra.gmra.mrb[4].mxu0 %v600_v13  ;;  %v753_v19 = vpop.f32.mrb[5].mxu1  ;;  %v1036_v13 = vand.u32 4294901760, %v1016_v60 }
 0x107   :  { %v4514_v28 = vmul.f32 -1.442695, %v753_v19  ;;  %v4770_v29 = vpop.f32.mrb[6].mxu1  ;;  %4876 = vmatpush1.bf16.msra.mxu0 %v5611_v10  ;;  %1738 = vmatprep.mubr.f32.mxu0 %v5254_v2 }
 0x108   :  { %5190 = vpow2.f32 %v4516_v16  ;;  %v4517_v34 = vmul.f32 -1.442695, %v4770_v29  ;;  %v756_v35 = vpop.f32.mrb[7].mxu1  ;;  %4878 = vmatprep.subr.bf16.mxu0 %v5505_v9  ;;  %v5639_v9 = vand.u32 4294901760, %v1126_v38  ;;  %v5152_v38 = vld [vmem:[%s6242_s10 + $0x48] ss:$16 sps:$4 sm:$0xff]  }
 0x109   :  { %5192 = vpow2.f32 %v4514_v28  ;;  %v4515_v36 = vmul.f32 -1.442695, %v756_v35 }
 0x10a   :  { %5194 = vpow2.f32 %v4517_v34  ;;  %1744 = vmatmul.mubr.f32.vlgmr.msra.gmra.mrb[6].mxu0 %v5613_v15  ;;  %v5154_v34 = vld [vmem:[%s6242_s10 + $0x4c] ss:$16 sps:$4 sm:$0xff]  }
 0x10b   :  { %5196 = vpow2.f32 %v4515_v36  ;;  %1749 = vmatprep.mubr.f32.mxu0 %v5254_v2  ;;  %4880 = vmatpush1.bf16.msra.mxu0 %v4879_v32  ;;  %v5675_v32 = vsub.f32 %v1016_v60, %v1036_v13 }
 0x10c   :  { %4882 = vmatprep.subr.bf16.mxu0 %v4881_v20 }
 0x10d   :  { %v1159_v36 = vand.u32 4294901760, %v5675_v32 }
 0x10e   :  { %1755 = vmatmul.mubr.f32.gmra.mrb[8].mxu0 %v5627_v37 }
 0x10f   :  { %1760 = vmatprep.mubr.f32.mxu0 %v5254_v2 }
 0x112   :  { %v5191_v44 = vpop.eup %5190  ;;  %1766 = vmatmul.mubr.f32.gmra.mrb[10].mxu0 %v5639_v9 }
 0x113   :  { %v5193_v46 = vpop.eup %5192  ;;  %v782_v49 = vadd.f32 1.0, %v5191_v44  ;;  %1771 = vmatprep.mubr.f32.mxu0 %v5254_v2  ;;  %v1011_v44 = vld [vmem:[%s6238_s6] sm:$0xff] }
 0x114   :  { %v5195_v0 = vpop.eup %5194  ;;  %v780_v1 = vadd.f32 1.0, %v5193_v46  ;;  %v1015_v46 = vld [vmem:[%s6238_s6 + $0x20] sm:$0xff] }
 0x115   :  { %v5197_v20 = vpop.eup %5196  ;;  %5198 = vrcp.f32 %v782_v49  ;;  %v783_v50 = vadd.f32 1.0, %v5195_v0  ;;  %v5155_v0 = vld [vmem:[%s6242_s10 + $0x68] ss:$16 sps:$4 sm:$0xff]  }
 0x116   :  { %5200 = vrcp.f32 %v780_v1  ;;  %v781_v53 = vadd.f32 1.0, %v5197_v20  ;;  %1777 = vmatmul.mubr.f32.gmra.mrb[12].mxu0 %v5645_v45  ;;  %v1034_v1 = vand.u32 4294901760, %v1011_v44  ;;  %v1038_v20 = vand.u32 4294901760, %v1015_v46 }
 0x117   :  { %5202 = vrcp.f32 %v783_v50  ;;  %1867 = vmatprep.mubr.f32.mxu0 %v5254_v2  ;;  %v5719_v50 = vpack.c.bf16 %v1036_v13, %v1032_v12 }
 0x118   :  { %5204 = vrcp.f32 %v781_v53 }
 0x11a   :  { %1869 = vmatmul.mubr.f32.vlgmr.msra.gmra.mrb[6].mxu0 %v5561_v40 }
 0x11b   :  { %1874 = vmatprep.mubr.f32.mxu0 %v5254_v2  ;;  %4884 = vmatpush1.bf16.msra.mxu0 %v4883_v55 }
 0x11c   :  { %4886 = vmatprep.subr.bf16.mxu0 %v5494_v63 }
 0x11e   :  { %1876 = vmatmul.mubr.f32.gmra.mrb[8].mxu0 %v5574_v48 }
 0x11f   :  { %v5199_v56 = vpop.eup %5198  ;;  %1881 = vmatprep.mubr.f32.mxu0 %v5254_v2 }
 0x120   :  { %v5201_v58 = vpop.eup %5200  ;;  %v794_v3 = vmul.f32 %v5199_v56, %v4769_v14  ;;  %v5151_v14 = vld [vmem:[%s6242_s10 + $0x2c] ss:$16 sps:$4 sm:$0xff]   ;;  %v5723_v56 = vpack.c.bf16 %v1038_v20, %v1034_v1 }
 0x121   :  { %v5203_v61 = vpop.eup %5202  ;;  %v792_v5 = vmul.f32 %v5201_v58, %v753_v19  ;;  %v5149_v19 = vld [vmem:[%s6242_s10 + $0x28] ss:$16 sps:$4 sm:$0xff]   ;;  %v5725_v58 = vsub.f32 %v1011_v44, %v1034_v1 }
 0x122   :  { %v5205_v62 = vpop.eup %5204  ;;  %v795_v4 = vmul.f32 %v5203_v61, %v4770_v29  ;;  %1883 = vmatmul.mubr.f32.gmra.mrb[10].mxu0 %v5591_v17  ;;  %v5673_v29 = vsub.f32 %v1012_v59, %v1032_v12  ;;  %v5727_v59 = vsub.f32 %v1015_v46, %v1038_v20  ;;  %v4891_v61 = vpack.c.bf16 %v1803_v52, %v1791_v51 }
 0x123   :  { %v793_v11 = vmul.f32 %v5205_v62, %v756_v35  ;;  %1888 = vmatprep.mubr.f32.mxu0 %v5254_v2  ;;  %v1153_v62 = vand.u32 4294901760, %v5725_v58 }
 0x124   :  { %v5665_v16 = vpack.c.bf16 %v795_v4, %v794_v3  ;;  %v1147_v35 = vand.u32 4294901760, %v5673_v29  ;;  %v1165_v3 = vand.u32 4294901760, %v5727_v59  ;;  %v4857_v4 = vpack.c.bf16 %v5675_v32, %v5673_v29 }
 0x125   :  { %v796_v28 = vpack.c.bf16 %v793_v11, %v792_v5  ;;  %v1154_v41 = vsub.f32 %v5725_v58, %v1153_v62  ;;  %v2384_v11 = vsel %vm708_vm6, %v5549_v33, 0 }
 0x126   :  { %1890 = vmatmul.mubr.f32.gmra.mrb[12].mxu0 %v5609_v8  ;;  %v1148_v49 = vsub.f32 %v5673_v29, %v1147_v35  ;;  %v1166_v42 = vsub.f32 %v5727_v59, %v1165_v3 }
 0x127   :  { %4534 = vmatmul.mubr.msk.bf16.vlgmr.msra.gmra.mrb[8].mxu1 %vm596_vm8, %v796_v28  ;;  %1968 = vmatprep.mubr.f32.mxu0 %v5254_v2 }
 0x128   :  { %955 = vmatpush1.bf16.msra.mxu1 %v5146_v21  ;;  %943 = vmatprep.mubr.bf16.mxu1 %v5260_v22  ;;  %v1149_v53 = vand.u32 4294901760, %v1148_v49  ;;  %v1167_v51 = vand.u32 4294901760, %v1166_v42 }
 0x129   :  { %956 = vmatprep.subr.bf16.mxu1 %v5151_v14 }
 0x12a   :  { %1971 = vmatmul.mubr.f32.vlgmr.msra.gmra.mrb[6].mxu0 %v5572_v47 }
 0x12b   :  { %1976 = vmatprep.mubr.f32.mxu0 %v5254_v2  ;;  %4888 = vmatpush1.bf16.msra.mxu0 %v5611_v10 }
 0x12c   :  { %957 = vmatpush1.bf16.msra.mxu1 %v5149_v19  ;;  %4890 = vmatprep.subr.bf16.mxu0 %v5537_v23  ;;  %v1160_v23 = vsub.f32 %v5675_v32, %v1159_v36 }
 0x12d   :  { %958 = vmatprep.subr.bf16.mxu1 %v5154_v34 }
 0x12e   :  { %1979 = vmatmul.mubr.f32.gmra.mrb[8].mxu0 %v5589_v57  ;;  %v1161_v55 = vand.u32 4294901760, %v1160_v23 }
 0x12f   :  { %4535 = vmatmul.mubr.msk.bf16.gmra.mrb[12].mxu1 %vm596_vm8, %v5665_v16  ;;  %1984 = vmatprep.mubr.f32.mxu0 %v5254_v2 }
 0x130   :  { %959 = vmatpush1.bf16.msra.mxu1 %v5152_v38  ;;  %986 = vmatprep.mubr.bf16.mxu1 %v5260_v22  ;;  %v4853_v60 = vpack.c.bf16 %v1161_v55, %v1149_v53 }
 0x131   :  { %960 = vmatprep.subr.bf16.mxu1 %v5157_v43 }
 0x132   :  { %1987 = vmatmul.mubr.f32.gmra.mrb[10].mxu0 %v5607_v7 }
 0x133   :  { %1992 = vmatprep.mubr.f32.mxu0 %v5254_v2 }
 0x134   :  { %961 = vmatpush1.bf16.msra.mxu1 %v5155_v0 }
 0x135   :  { %4850 = vmatprep.subr.bf16.mxu1 %v5719_v50 }
 0x136   :  { %1995 = vmatmul.mubr.f32.gmra.mrb[12].mxu0 %v5621_v26 }
 0x137   :  { %4536 = vmatmul.mubr.msk.bf16.vlgmr.msra.gmra.mrb[16].mxu1 %vm596_vm8, %v796_v28  ;;  %2069 = vmatprep.mubr.f32.mxu0 %v5254_v2 }
 0x138   :  { %4852 = vmatpush1.bf16.msra.mxu1 %v5723_v56  ;;  %996 = vmatprep.mubr.bf16.mxu1 %v5260_v22  ;;  %v1155_v22 = vand.u32 4294901760, %v1154_v41 }
 0x139   :  { %4854 = vmatprep.subr.bf16.mxu1 %v4853_v60 }
 0x13a   :  { %2073 = vmatmul.mubr.f32.vlgmr.msra.gmra.mrb[6].mxu0 %v5585_v54  ;;  %v4855_v52 = vpack.c.bf16 %v1167_v51, %v1155_v22 }
 0x13b   :  { %2078 = vmatprep.mubr.f32.mxu0 %v5254_v2  ;;  %4892 = vmatpush1.bf16.msra.mxu0 %v4891_v61 }
 0x13c   :  { %4894 = vmatprep.subr.bf16.mxu0 %v5494_v63  ;;  %v4859_v63 = vpack.c.bf16 %v5727_v59, %v5725_v58 }
 0x13e   :  { %2082 = vmatmul.mubr.f32.gmra.mrb[8].mxu0 %v5604_v6 }
 0x13f   :  { %4537 = vmatmul.mubr.msk.bf16.gmra.mrb[20].mxu1 %vm596_vm8, %v5665_v16  ;;  %2087 = vmatprep.mubr.f32.mxu0 %v5254_v2 }
 0x140   :  { %1100 = vmatprep.mubr.f32.mxu1 %v5254_v2 }
 0x142   :  { %2091 = vmatmul.mubr.f32.gmra.mrb[10].mxu0 %v5618_v24 }
 0x143   :  { %2096 = vmatprep.mubr.f32.mxu0 %v5254_v2 }
 0x146   :  { %2100 = vmatmul.mubr.f32.gmra.mrb[12].mxu0 %v5632_v39 }
 0x147   :  { %1106 = vmatmul.mubr.f32.vlgmr.msra.gmra.mrb[2].mxu1 %v5613_v15  ;;  %2182 = vmatprep.mubr.f32.mxu0 %v5254_v2  ;;  %v2375_v15 = vsel %vm708_vm6, %v5539_v25, 0 }
 0x148   :  { %1111 = vmatprep.mubr.f32.mxu1 %v5254_v2  ;;  %4856 = vmatpush1.bf16.msra.mxu1 %v4855_v52 }
 0x149   :  { %4858 = vmatprep.subr.bf16.mxu1 %v4857_v4 }
 0x14a   :  { %2184 = vmatmul.mubr.f32.vlgmr.msra.gmra.mrb[6].mxu0 %v5561_v40 }
 0x14b   :  { %1117 = vmatmul.mubr.f32.gmra.mrb[24].mxu1 %v5627_v37  ;;  %2189 = vmatprep.mubr.f32.mxu0 %v5254_v2  ;;  %v2378_v37 = vsel %vm708_vm6, %v5542_v30, 0 }
 0x14c   :  { %1122 = vmatprep.mubr.f32.mxu1 %v5254_v2  ;;  %4896 = vmatpush1.bf16.msra.mxu0 %v5611_v10  ;;  %v4865_v10 = vpack.c.bf16 %v1159_v36, %v1147_v35 }
 0x14e   :  { %2191 = vmatmul.mubr.f32.gmra.mrb[8].mxu0 %v5574_v48 }
 0x14f   :  { %1128 = vmatmul.mubr.f32.gmra.mrb[26].mxu1 %v5639_v9  ;;  %2196 = vmatprep.mubr.f32.mxu0 %v5254_v2  ;;  %v2462_v9 = vand.u32 4294901760, %v2378_v37 }
 0x150   :  { %1133 = vmatprep.mubr.f32.mxu1 %v5254_v2 }
 0x151   :  { %v2463_v30 = vsub.f32 %v2378_v37, %v2462_v9 }
 0x152   :  { %2198 = vmatmul.mubr.f32.gmra.mrb[10].mxu0 %v5591_v17 }
 0x153   :  { %1139 = vmatmul.mubr.f32.gmra.mrb[28].mxu1 %v5645_v45  ;;  %2203 = vmatprep.mubr.f32.mxu0 %v5254_v2  ;;  %v2464_v16 = vand.u32 4294901760, %v2463_v30 }
 0x154   :  { %1229 = vmatprep.mubr.f32.mxu1 %v5254_v2 }
 0x155   :  { %v2465_v33 = vsub.f32 %v2463_v30, %v2464_v16 }
 0x156   :  { %2205 = vmatmul.mubr.f32.gmra.mrb[12].mxu0 %v5609_v8 }
 0x157   :  { %1231 = vmatmul.mubr.f32.vlgmr.msra.gmra.mrb[2].mxu1 %v5561_v40  ;;  %2279 = vmatprep.mubr.f32.mxu0 %v5254_v2  ;;  %v2466_v19 = vand.u32 4294901760, %v2465_v33 }
 0x158   :  { %1236 = vmatprep.mubr.f32.mxu1 %v5254_v2  ;;  %4860 = vmatpush1.bf16.msra.mxu1 %v4859_v63 }
 0x159   :  { %4862 = vmatprep.subr.bf16.mxu1 %v5719_v50 }
 0x15a   :  { %2281 = vmatmul.mubr.f32.vlgmr.msra.gmra.mrb[6].mxu0 %v5561_v40 }
 0x15b   :  { %1238 = vmatmul.mubr.f32.gmra.mrb[24].mxu1 %v5574_v48  ;;  %2286 = vmatprep.mubr.f32.mxu0 %v5254_v2 }
 0x15c   :  { %1243 = vmatprep.mubr.f32.mxu1 %v5254_v2 }
 0x15e   :  { %2288 = vmatmul.mubr.f32.gmra.mrb[8].mxu0 %v5574_v48 }
 0x15f   :  { %1245 = vmatmul.mubr.f32.gmra.mrb[26].mxu1 %v5591_v17  ;;  %2293 = vmatprep.mubr.f32.mxu0 %v5254_v2 }
 0x160   :  { %1250 = vmatprep.mubr.f32.mxu1 %v5254_v2 }
 0x162   :  { %2295 = vmatmul.mubr.f32.gmra.mrb[10].mxu0 %v5591_v17 }
 0x163   :  { %1252 = vmatmul.mubr.f32.gmra.mrb[28].mxu1 %v5609_v8  ;;  %2300 = vmatprep.mubr.f32.mxu0 %v5254_v2 }
 0x164   :  { %1330 = vmatprep.mubr.f32.mxu1 %v5254_v2 }
 0x166   :  { %2302 = vmatmul.mubr.f32.gmra.mrb[12].mxu0 %v5609_v8 }
 0x167   :  { %1333 = vmatmul.mubr.f32.vlgmr.msra.gmra.mrb[2].mxu1 %v5572_v47  ;;  %3110 = vmatprep.mubr.f32.mxu0 %v5254_v2  ;;  %v4867_v47 = vpack.c.bf16 %v1165_v3, %v1153_v62 }
 0x168   :  { %1338 = vmatprep.mubr.f32.mxu1 %v5254_v2  ;;  %4864 = vmatpush1.bf16.msra.mxu1 %v5723_v56 }
 0x169   :  { %4866 = vmatprep.subr.bf16.mxu1 %v4865_v10 }
 0x16b   :  { %1341 = vmatmul.mubr.f32.gmra.mrb[24].mxu1 %v5589_v57  ;;  %v2341_v57 = vld [vmem:[#allocation2] sm:$0xff] }
 0x16c   :  { %1346 = vmatprep.mubr.f32.mxu1 %v5254_v2 }
 0x16f   :  { %1349 = vmatmul.mubr.f32.gmra.mrb[26].mxu1 %v5607_v7  ;;  %v5823_v7 = vand.u32 4294901760, %v2341_v57 }
 0x170   :  { %1354 = vmatprep.mubr.f32.mxu1 %v5254_v2 }
 0x173   :  { %1357 = vmatmul.mubr.f32.gmra.mrb[28].mxu1 %v5621_v26  ;;  %v5836_v26 = vand.u32 4294901760, %v2375_v15 }
 0x174   :  { %1431 = vmatprep.mubr.f32.mxu1 %v5254_v2 }
 0x175   :  { %v2453_v25 = vsub.f32 %v2375_v15, %v5836_v26 }
 0x177   :  { %1435 = vmatmul.mubr.f32.vlgmr.msra.gmra.mrb[2].mxu1 %v5585_v54  ;;  %v2494_v54 = vsub.f32 %v2341_v57, %v5823_v7  ;;  %v2454_v12 = vand.u32 4294901760, %v2453_v25 }
 0x178   :  { %1440 = vmatprep.mubr.f32.mxu1 %v5254_v2  ;;  %4868 = vmatpush1.bf16.msra.mxu1 %v4867_v47 }
 0x179   :  { %4870 = vmatprep.subr.bf16.mxu1 %v5719_v50  ;;  %v2455_v14 = vsub.f32 %v2453_v25, %v2454_v12 }
 0x17b   :  { %1444 = vmatmul.mubr.f32.gmra.mrb[24].mxu1 %v5604_v6  ;;  %v2495_v6 = vand.u32 4294901760, %v2494_v54  ;;  %v2456_v29 = vand.u32 4294901760, %v2455_v14 }
 0x17c   :  { %1449 = vmatprep.mubr.f32.mxu1 %v5254_v2 }
 0x17f   :  { %1453 = vmatmul.mubr.f32.gmra.mrb[26].mxu1 %v5618_v24  ;;  %v2496_v24 = vsub.f32 %v2494_v54, %v2495_v6 }
 0x180   :  { %1458 = vmatprep.mubr.f32.mxu1 %v5254_v2 }
 0x181   :  { %v2497_v45 = vand.u32 4294901760, %v2496_v24 }
 0x183   :  { %1462 = vmatmul.mubr.f32.gmra.mrb[28].mxu1 %v5632_v39  ;;  %v2381_v39 = vsel %vm708_vm6, %v5544_v31, 0  ;;  %v2482_v31 = vand.u32 4294901760, %v2384_v11 }
 0x184   :  { %1544 = vmatprep.mubr.f32.mxu1 %v5254_v2  ;;  %v2472_v5 = vand.u32 4294901760, %v2381_v39 }
 0x185   :  { %v2483_v21 = vsub.f32 %v2384_v11, %v2482_v31 }
 0x186   :  { %v2473_v13 = vsub.f32 %v2381_v39, %v2472_v5 }
 0x187   :  { %1546 = vmatmul.mubr.f32.vlgmr.msra.gmra.mrb[2].mxu1 %v5561_v40 }
 0x188   :  { %1551 = vmatprep.mubr.f32.mxu1 %v5254_v2  ;;  %4872 = vmatpush1.bf16.msra.mxu1 %v5723_v56  ;;  %v2474_v28 = vand.u32 4294901760, %v2473_v13 }
 0x189   :  { %4771 = vmatprep.subr.mxu1 %v5823_v7 }
 0x18a   :  { %v2475_v32 = vsub.f32 %v2473_v13, %v2474_v28 }
 0x18b   :  { %1553 = vmatmul.mubr.f32.gmra.mrb[24].mxu1 %v5574_v48 }
 0x18c   :  { %1558 = vmatprep.mubr.f32.mxu1 %v5254_v2 }
 0x18f   :  { %1560 = vmatmul.mubr.f32.gmra.mrb[26].mxu1 %v5591_v17 }
 0x190   :  { %1565 = vmatprep.mubr.f32.mxu1 %v5254_v2 }
 0x193   :  { %1567 = vmatmul.mubr.f32.gmra.mrb[28].mxu1 %v5609_v8 }
 0x194   :  { %1641 = vmatprep.mubr.f32.mxu1 %v5254_v2 }
 0x197   :  { %1643 = vmatmul.mubr.f32.vlgmr.msra.gmra.mrb[2].mxu1 %v5561_v40  ;;  %v2484_v40 = vand.u32 4294901760, %v2483_v21 }
 0x198   :  { %1648 = vmatprep.mubr.f32.mxu1 %v5254_v2  ;;  %4772 = vmatpush3.msra.mxu1 %v5823_v7 }
 0x199   :  { %4779 = vmatprep.subr.mxu1 %v2497_v45  ;;  %v2485_v34 = vsub.f32 %v2483_v21, %v2484_v40 }
 0x19b   :  { %1650 = vmatmul.mubr.f32.gmra.mrb[24].mxu1 %v5574_v48  ;;  %v2476_v48 = vand.u32 4294901760, %v2475_v32  ;;  %v2486_v35 = vand.u32 4294901760, %v2485_v34 }
 0x19c   :  { %1655 = vmatprep.mubr.f32.mxu1 %v5254_v2 }
 0x19f   :  { %1657 = vmatmul.mubr.f32.gmra.mrb[26].mxu1 %v5591_v17 }
 0x1a0   :  { %1662 = vmatprep.mubr.f32.mxu1 %v5254_v2 }
 0x1a3   :  { %1664 = vmatmul.mubr.f32.gmra.mrb[28].mxu1 %v5609_v8 }
 0x1a4   :  { %4773 = vmatprep.mubr.f32.mxu1 %v2456_v29 }
 0x1a7   :  { %4774 = vmatmul.mubr.f32.vlgmr.msra.gmra.mrb[30].mxu1 %v2466_v19 }
 0x1a8   :  { %4780 = vmatpush3.msra.mxu1 %v2497_v45  ;;  %4776 = vmatprep.mubr.f32.mxu1 %v2476_v48 }
 0x1a9   :  { %4787 = vmatprep.subr.mxu1 %v2494_v54 }
 0x1ab   :  { %4777 = vmatmul.mubr.f32.gmra.mrb[32].mxu1 %v2486_v35 }
 0x1ac   :  { %4781 = vmatprep.mubr.f32.mxu1 %v5836_v26 }
 0x1af   :  { %4782 = vmatmul.mubr.f32.vlgmr.msra.gmra.mrb[30].mxu1 %v2462_v9 }
 0x1b0   :  { %4788 = vmatpush3.msra.mxu1 %v2494_v54  ;;  %4784 = vmatprep.mubr.f32.mxu1 %v2472_v5 }
 0x1b1   :  { %4795 = vmatprep.subr.mxu1 %v5823_v7 }
 0x1b3   :  { %4785 = vmatmul.mubr.f32.gmra.mrb[32].mxu1 %v2482_v31 }
 0x1b4   :  { %4789 = vmatprep.mubr.f32.mxu1 %v2453_v25 }
 0x1b7   :  { %4790 = vmatmul.mubr.f32.vlgmr.msra.gmra.mrb[30].mxu1 %v2463_v30 }
 0x1b8   :  { %4796 = vmatpush3.msra.mxu1 %v5823_v7  ;;  %4792 = vmatprep.mubr.f32.mxu1 %v2473_v13 }
 0x1b9   :  { %4803 = vmatprep.subr.mxu1 %v2495_v6 }
 0x1bb   :  { %4793 = vmatmul.mubr.f32.gmra.mrb[32].mxu1 %v2483_v21 }
 0x1bc   :  { %4797 = vmatprep.mubr.f32.mxu1 %v2454_v12 }
 0x1bf   :  { %4798 = vmatmul.mubr.f32.vlgmr.msra.gmra.mrb[30].mxu1 %v2464_v16 }
 0x1c0   :  { %4804 = vmatpush3.msra.mxu1 %v2495_v6  ;;  %4800 = vmatprep.mubr.f32.mxu1 %v2474_v28 }
 0x1c1   :  { %4811 = vmatprep.subr.mxu1 %v5823_v7 }
 0x1c3   :  { %4801 = vmatmul.mubr.f32.gmra.mrb[32].mxu1 %v2484_v40 }
 0x1c4   :  { %4805 = vmatprep.mubr.f32.mxu1 %v5836_v26 }
 0x1c7   :  { %4806 = vmatmul.mubr.f32.vlgmr.msra.gmra.mrb[30].mxu1 %v2462_v9 }
 0x1c8   :  { %4812 = vmatpush3.msra.mxu1 %v5823_v7  ;;  %4808 = vmatprep.mubr.f32.mxu1 %v2472_v5 }
 0x1cb   :  { %4809 = vmatmul.mubr.f32.gmra.mrb[32].mxu1 %v2482_v31 }
 0x1cc   :  { %4813 = vmatprep.mubr.f32.mxu1 %v5836_v26 }
 0x1cf   :  { %4814 = vmatmul.mubr.f32.vlgmr.msra.gmra.mrb[30].mxu1 %v2462_v9 }
 0x1d0   :  { %4816 = vmatprep.mubr.f32.mxu1 %v2472_v5 }
 0x1d3   :  { %4817 = vmatmul.mubr.f32.gmra.mrb[32].mxu1 %v2482_v31 }
 0x1d4   :  { %3653 = vmatprep.mubr.f32.mxu1 %v5254_v2 }
 0x1d9   :  { %v683_v17 = vpop.f32.mrb[4].mxu0 }
 0x1da   :  { %v687_v8 = vmul.f32 0.088388346, %v683_v17  ;;  %v4764_v36 = vpop.f32.mrb[5].mxu0 }
 0x1dc   :  { %688 = vst.msk [vmem:[#allocation6] sm:$0xff] %vm56_vm3, %v687_v8 }
 0x1fa   :  { %v935_v38 = vpop.f32.mrb[8].mxu1 }
 0x1fb   :  { %v937_v43 = vpop.f32.mrb[9].mxu1 }
 0x1fc   :  { %v939_v44 = vpop.f32.mrb[10].mxu1 }
 0x1fd   :  { %v941_v46 = vpop.f32.mrb[11].mxu1 }
 0x202   :  { %v945_v49 = vpop.f32.mrb[12].mxu1 }
 0x203   :  { %v947_v23 = vpop.f32.mrb[13].mxu1 }
 0x204   :  { %v949_v0 = vpop.f32.mrb[14].mxu1 }
 0x205   :  { %v951_v1 = vpop.f32.mrb[15].mxu1 }
 0x20a   :  { %v988_v20 = vpop.f32.mrb[16].mxu1 }
 0x20b   :  { %v990_v50 = vpop.f32.mrb[17].mxu1 }
 0x20c   :  { %v992_v53 = vpop.f32.mrb[18].mxu1 }
 0x20d   :  { %v994_v55 = vpop.f32.mrb[19].mxu1 }
 0x212   :  { %v998_v56 = vpop.f32.mrb[20].mxu1 }
 0x213   :  { %v1000_v58 = vpop.f32.mrb[21].mxu1 }
 0x214   :  { %v1002_v59 = vpop.f32.mrb[22].mxu1 }
 0x215   :  { %v1004_v60 = vpop.f32.mrb[23].mxu1 }
 0x22d   :  { %v2282_v61 = vpop.f32.mrb[6].mxu0 }
 0x22e   :  { %v5864_v62 = vmul.f32 %v2282_v61, %v988_v20  ;;  %v2284_v3 = vpop.f32.mrb[7].mxu0 }
 0x22f   :  { %v5866_v41 = vmul.f32 %v2284_v3, %v990_v50 }
 0x231   :  { %v2289_v42 = vpop.f32.mrb[8].mxu0 }
 0x232   :  { %v2314_v22 = vmul.f32 %v2289_v42, %v992_v53  ;;  %v2291_v51 = vpop.f32.mrb[9].mxu0 }
 0x233   :  { %v2315_v52 = vmul.f32 %v2291_v51, %v994_v55 }
 0x235   :  { %v2296_v4 = vpop.f32.mrb[10].mxu0 }
 0x236   :  { %v5868_v63 = vmul.f32 %v2296_v4, %v998_v56  ;;  %v2298_v10 = vpop.f32.mrb[11].mxu0 }
 0x237   :  { %v5870_v47 = vmul.f32 %v2298_v10, %v1000_v58 }
 0x239   :  { %v2303_v57 = vpop.f32.mrb[12].mxu0 }
 0x23a   :  { %v5872_v7 = vmul.f32 %v2303_v57, %v1002_v59  ;;  %v2305_v54 = vpop.f32.mrb[13].mxu0  ;;  %v5924_v59 = vsel %vm2338_vm5, 1.0, %v5254_v2 }
 0x23b   :  { %v5874_v6 = vmul.f32 %v2305_v54, %v1004_v60  ;;  %v3036_v27 = vsel %vm56_vm3, %v5924_v59, 0 }
 0x26a   :  { %v1644_v15 = vpop.f32.mrb[2].mxu1 }
 0x26b   :  { %v2308_v24 = vmul.f32 %v1644_v15, %v935_v38  ;;  %v1646_v26 = vpop.f32.mrb[3].mxu1 }
 0x26c   :  { %v2309_v37 = vmul.f32 %v1646_v26, %v937_v43 }
 0x26e   :  { %v1651_v39 = vpop.f32.mrb[24].mxu1 }
 0x26f   :  { %v2312_v9 = vmul.f32 %v1651_v39, %v939_v44  ;;  %v1653_v45 = vpop.f32.mrb[25].mxu1 }
 0x270   :  { %v2313_v25 = vmul.f32 %v1653_v45, %v941_v46 }
 0x272   :  { %v1658_v5 = vpop.f32.mrb[26].mxu1 }
 0x273   :  { %v5876_v11 = vmul.f32 %v1658_v5, %v945_v49  ;;  %v1660_v30 = vpop.f32.mrb[27].mxu1 }
 0x274   :  { %v5878_v31 = vmul.f32 %v1660_v30, %v947_v23 }
 0x276   :  { %v1665_v12 = vpop.f32.mrb[28].mxu1 }
 0x277   :  { %v5880_v13 = vmul.f32 %v1665_v12, %v949_v0  ;;  %v1667_v16 = vpop.f32.mrb[29].mxu1 }
 0x278   :  { %v5882_v21 = vmul.f32 %v1667_v16, %v951_v1 }
 0x2a2   :  { %v4815_v28 = vpop.f32.mrb[30].mxu1 }
 0x2a3   :  { %2967 = vrot.lane.b32.xlu1 %v4815_v28, %s5259_s30  ;;  %v2939_v14 = vpop.f32.mrb[31].mxu1 }
 0x2a6   :  { %v5885_v33 = vpop.f32.mrb[32].mxu1 }
 0x2a7   :  { %2979 = vrot.lane.b32.xlu1 %v4815_v28, %s5257_s21  ;;  %v5888_v40 = vpop.f32.mrb[33].mxu1 }
 0x2ab   :  { %2991 = vrot.lane.b32.xlu1 %v4815_v28, %s5258_s24 }
 0x2af   :  { %2965 = vrot.lane.b32.xlu1 %v2939_v14, %s5259_s30 }
 0x2b3   :  { %2977 = vrot.lane.b32.xlu1 %v2939_v14, %s5257_s21 }
 0x2b7   :  { %2989 = vrot.lane.b32.xlu1 %v2939_v14, %s5258_s24 }
 0x2bb   :  { %2971 = vrot.lane.b32.xlu1 %v5885_v33, %s5259_s30 }
 0x2bf   :  { %2983 = vrot.lane.b32.xlu1 %v5885_v33, %s5257_s21 }
 0x2c3   :  { %2969 = vrot.lane.b32.xlu1 %v5888_v40, %s5259_s30 }
 0x2c7   :  { %2981 = vrot.lane.b32.xlu1 %v5888_v40, %s5257_s21 }
 0x2cb   :  { %2993 = vrot.lane.b32.xlu1 %v5888_v40, %s5258_s24 }
 0x2cf   :  { %2995 = vrot.lane.b32.xlu1 %v5885_v33, %s5258_s24 }
 0x315   :  { %v2968_v29 = vpop.permute.xlu1 %2967 }
 0x316   :  { %v3003_v19 = vsel %vm56_vm3, %v4815_v28, %v2968_v29 }
 0x319   :  { %v2980_v32 = vpop.permute.xlu1 %2979 }
 0x31a   :  { %v3007_v34 = vsel %vm596_vm8, %v3003_v19, %v2980_v32 }
 0x31d   :  { %v2992_v48 = vpop.permute.xlu1 %2991 }
 0x31e   :  { %v3012_v35 = vsel %vm598_vm9, %v3007_v34, %v2992_v48 }
 0x31f   :  { %v3019_v17 = vmul.f32 %v3012_v35, %v2312_v9  ;;  %v3020_v8 = vmul.f32 %v3012_v35, %v2313_v25  ;;  %v3021_v36 = vmul.f32 %v3012_v35, %v2314_v22  ;;  %v3022_v38 = vmul.f32 %v3012_v35, %v2315_v52 }
 0x321   :  { %v3044_v43 = vand.u32 4294901760, %v3019_v17  ;;  %v2966_v44 = vpop.permute.xlu1 %2965  ;;  %v3042_v46 = vand.u32 4294901760, %v3020_v8  ;;  %v3585_v49 = vand.u32 4294901760, %v3022_v38  ;;  %v3587_v23 = vand.u32 4294901760, %v3021_v36 }
 0x322   :  { %v3002_v58 = vsel %vm56_vm3, %v2939_v14, %v2966_v44 }
 0x323   :  { %v5909_v0 = vsub.f32 %v3019_v17, %v3044_v43  ;;  %v5911_v1 = vsub.f32 %v3020_v8, %v3042_v46  ;;  %v5913_v50 = vsub.f32 %v3022_v38, %v3585_v49  ;;  %v5915_v53 = vsub.f32 %v3021_v36, %v3587_v23 }
 0x325   :  { %v2978_v20 = vpop.permute.xlu1 %2977  ;;  %v3136_v55 = vand.u32 4294901760, %v5911_v1  ;;  %v3142_v56 = vand.u32 4294901760, %v5909_v0  ;;  %v3679_v3 = vand.u32 4294901760, %v5913_v50  ;;  %v3685_v52 = vand.u32 4294901760, %v5915_v53 }
 0x326   :  { %v3006_v60 = vsel %vm596_vm8, %v3002_v58, %v2978_v20 }
 0x327   :  { %v3137_v22 = vsub.f32 %v5911_v1, %v3136_v55  ;;  %v3143_v51 = vsub.f32 %v5909_v0, %v3142_v56  ;;  %v3680_v25 = vsub.f32 %v5913_v50, %v3679_v3  ;;  %v3686_v30 = vsub.f32 %v5915_v53, %v3685_v52 }
 0x329   :  { %v2990_v61 = vpop.permute.xlu1 %2989  ;;  %v3138_v45 = vand.u32 4294901760, %v3137_v22  ;;  %v3144_v5 = vand.u32 4294901760, %v3143_v51  ;;  %v3687_v17 = vand.u32 4294901760, %v3686_v30 }
 0x32a   :  { %v3011_v42 = vsel %vm598_vm9, %v3006_v60, %v2990_v61 }
 0x32b   :  { %v3015_v4 = vmul.f32 %v3011_v42, %v2308_v24  ;;  %v3016_v10 = vmul.f32 %v3011_v42, %v2309_v37  ;;  %v3017_v57 = vmul.f32 %v3011_v42, %v5864_v62  ;;  %v3018_v18 = vmul.f32 %v3011_v42, %v5866_v41 }
 0x32d   :  { %v3040_v54 = vand.u32 4294901760, %v3015_v4  ;;  %v3583_v15 = vand.u32 4294901760, %v3017_v57  ;;  %v2972_v26 = vpop.permute.xlu1 %2971  ;;  %v3038_v39 = vand.u32 4294901760, %v3016_v10  ;;  %v3581_v9 = vand.u32 4294901760, %v3018_v18 }
 0x32f   :  { %v5938_v24 = vsub.f32 %v3015_v4, %v3040_v54  ;;  %v5940_v37 = vsub.f32 %v3017_v57, %v3583_v15  ;;  %v5942_v62 = vpack.c.bf16 %v3042_v46, %v3038_v39  ;;  %v5944_v41 = vsub.f32 %v3016_v10, %v3038_v39 }
 0x330   :  { %v5946_v12 = vpack.c.bf16 %v3585_v49, %v3581_v9  ;;  %v5948_v16 = vsub.f32 %v3018_v18, %v3581_v9  ;;  %v5950_v28 = vpack.c.bf16 %v3044_v43, %v3040_v54  ;;  %v5952_v14 = vpack.c.bf16 %v3587_v23, %v3583_v15 }
 0x331   :  { %v2984_v29 = vpop.permute.xlu1 %2983  ;;  %4898 = vmatprep.subr.bf16.mxu0 %v5942_v62  ;;  %v3124_v32 = vand.u32 4294901760, %v5944_v41  ;;  %v3130_v19 = vand.u32 4294901760, %v5938_v24  ;;  %v3673_v34 = vand.u32 4294901760, %v5940_v37  ;;  %v4913_v48 = vpack.c.bf16 %v5911_v1, %v5944_v41  ;;  %v5159_v1 = vld [vmem:[%s6243_s11] sm:$0xff]  }
 0x332   :  { %4946 = vmatprep.subr.bf16.mxu1 %v5946_v12  ;;  %4900 = vmatpush1.bf16.msra.mxu0 %v5950_v28  ;;  %v3667_v35 = vand.u32 4294901760, %v5948_v16  ;;  %v4961_v8 = vpack.c.bf16 %v5913_v50, %v5948_v16  ;;  %v4915_v36 = vpack.c.bf16 %v5909_v0, %v5938_v24  ;;  %v4963_v46 = vpack.c.bf16 %v5915_v53, %v5940_v37  ;;  %v5158_v0 = vld [vmem:[%s6243_s11 + $0x40] sm:$0xff]   ;;  %v5160_v50 = vld [vmem:[%s6243_s11 + $0x48] sm:$0xff]   ;;  %v5162_v53 = vld [vmem:[%s6243_s11 + $0x50] sm:$0xff]  }
 0x333   :  { %4948 = vmatpush1.bf16.msra.mxu1 %v5952_v14  ;;  %v3125_v38 = vsub.f32 %v5944_v41, %v3124_v32  ;;  %v3131_v43 = vsub.f32 %v5938_v24, %v3130_v19  ;;  %v3674_v44 = vsub.f32 %v5940_v37, %v3673_v34  ;;  %v5974_v23 = vpack.c.bf16 %v3136_v55, %v3124_v32  ;;  %v5163_v24 = vld [vmem:[%s6243_s11 + $0x10] sm:$0xff]   ;;  %v5165_v37 = vld [vmem:[%s6243_s11 + $0x18] sm:$0xff]   ;;  %v5167_v41 = vld [vmem:[%s6243_s11 + $0x20] sm:$0xff]  }
 0x334   :  { %v3668_v49 = vsub.f32 %v5948_v16, %v3667_v35  ;;  %v5976_v20 = vpack.c.bf16 %v3679_v3, %v3667_v35  ;;  %v5978_v58 = vpack.c.bf16 %v3142_v56, %v3130_v19  ;;  %v5980_v51 = vpack.c.bf16 %v3685_v52, %v3673_v34  ;;  %v5169_v16 = vld [vmem:[%s6243_s11 + $0x28] sm:$0xff]  }
 0x335   :  { %v2970_v60 = vpop.permute.xlu1 %2969  ;;  %v3126_v61 = vand.u32 4294901760, %v3125_v38  ;;  %v3132_v42 = vand.u32 4294901760, %v3131_v43  ;;  %v3675_v22 = vand.u32 4294901760, %v3674_v44  ;;  %v5982_v4 = vsub.f32 %v3036_v27, %v3036_v27 }
 0x336   :  { %v3669_v10 = vand.u32 4294901760, %v3668_v49  ;;  %v3681_v57 = vand.u32 4294901760, %v3680_v25  ;;  %v3004_v39 = vsel %vm56_vm3, %v5888_v40, %v2970_v60  ;;  %v3005_v27 = vsel %vm56_vm3, %v5885_v33, %v2972_v26 }
 0x337   :  { %v4905_v18 = vpack.c.bf16 %v3138_v45, %v3126_v61  ;;  %v5984_v54 = vpack.c.bf16 %v3144_v5, %v3132_v42  ;;  %v5986_v15 = vpack.c.bf16 %v3687_v17, %v3675_v22  ;;  %v5989_v56 = vand.u32 4294901760, %v5982_v4 }
 0x338   :  { %v4953_v55 = vpack.c.bf16 %v3681_v57, %v3669_v10  ;;  %v3009_v40 = vsel %vm596_vm8, %v3005_v27, %v2984_v29 }
 0x339   :  { %v2982_v3 = vpop.permute.xlu1 %2981  ;;  %v3114_v25 = vsub.f32 %v5982_v4, %v5989_v56 }
 0x33a   :  { %v3008_v52 = vsel %vm596_vm8, %v3004_v39, %v2982_v3 }
 0x33b   :  { %v3115_v43 = vand.u32 4294901760, %v3114_v25 }
 0x33d   :  { %v2994_v9 = vpop.permute.xlu1 %2993 }
 0x33e   :  { %v3013_v45 = vsel %vm598_vm9, %v3008_v52, %v2994_v9 }
 0x33f   :  { %v3023_v5 = vmul.f32 %v3013_v45, %v5876_v11  ;;  %v3024_v30 = vmul.f32 %v3013_v45, %v5878_v31  ;;  %v3025_v32 = vmul.f32 %v3013_v45, %v5868_v63  ;;  %v3026_v19 = vmul.f32 %v3013_v45, %v5870_v47 }
 0x341   :  { %v3048_v34 = vand.u32 4294901760, %v3023_v5  ;;  %v3591_v35 = vand.u32 4294901760, %v3025_v32  ;;  %v2996_v17 = vpop.permute.xlu1 %2995  ;;  %v3046_v38 = vand.u32 4294901760, %v3024_v30  ;;  %v3589_v33 = vand.u32 4294901760, %v3026_v19 }
 0x342   :  { %v3014_v26 = vsel %vm598_vm9, %v3009_v40, %v2996_v17 }
 0x343   :  { %v6005_v44 = vsub.f32 %v3023_v5, %v3048_v34  ;;  %v6007_v49 = vsub.f32 %v3025_v32, %v3591_v35  ;;  %v3027_v11 = vmul.f32 %v3014_v26, %v5880_v13  ;;  %v3028_v63 = vmul.f32 %v3014_v26, %v5882_v21 }
 0x344   :  { %v3029_v47 = vmul.f32 %v3014_v26, %v5872_v7  ;;  %v3030_v31 = vmul.f32 %v3014_v26, %v5874_v6  ;;  %v6013_v29 = vsub.f32 %v3024_v30, %v3046_v38  ;;  %v6015_v60 = vsub.f32 %v3026_v19, %v3589_v33 }
 0x345   :  { %v3052_v61 = vand.u32 4294901760, %v3027_v11  ;;  %v3050_v42 = vand.u32 4294901760, %v3028_v63  ;;  %v3154_v22 = vand.u32 4294901760, %v6005_v44  ;;  %v3697_v10 = vand.u32 4294901760, %v6007_v49 }
 0x346   :  { %v3595_v57 = vand.u32 4294901760, %v3029_v47  ;;  %v3593_v3 = vand.u32 4294901760, %v3030_v31  ;;  %v3148_v13 = vand.u32 4294901760, %v6013_v29  ;;  %v3691_v21 = vand.u32 4294901760, %v6015_v60 }
 0x347   :  { %v6021_v39 = vsub.f32 %v3027_v11, %v3052_v61  ;;  %v6023_v7 = vpack.c.bf16 %v3050_v42, %v3046_v38  ;;  %v3159_v6 = vsub.f32 %v3028_v63, %v3050_v42  ;;  %v6025_v52 = vpack.c.bf16 %v3052_v61, %v3048_v34 }
 0x348   :  { %v6027_v9 = vsub.f32 %v3029_v47, %v3595_v57  ;;  %v6029_v27 = vpack.c.bf16 %v3593_v3, %v3589_v33  ;;  %v3702_v45 = vsub.f32 %v3030_v31, %v3593_v3  ;;  %v6031_v25 = vpack.c.bf16 %v3595_v57, %v3591_v35 }
 0x349   :  { %4902 = vmatprep.subr.bf16.mxu0 %v6023_v7  ;;  %v3149_v5 = vsub.f32 %v6013_v29, %v3148_v13  ;;  %v3160_v30 = vand.u32 4294901760, %v3159_v6  ;;  %v3692_v32 = vsub.f32 %v6015_v60, %v3691_v21  ;;  %v3155_v19 = vsub.f32 %v6005_v44, %v3154_v22 }
 0x34a   :  { %4950 = vmatprep.subr.bf16.mxu1 %v6029_v27  ;;  %4904 = vmatpush1.bf16.msra.mxu0 %v6025_v52  ;;  %v3703_v40 = vand.u32 4294901760, %v3702_v45  ;;  %v3166_v34 = vand.u32 4294901760, %v6021_v39  ;;  %v3698_v17 = vsub.f32 %v6007_v49, %v3697_v10  ;;  %v3709_v35 = vand.u32 4294901760, %v6027_v9 }
 0x34b   :  { %4952 = vmatpush1.bf16.msra.mxu1 %v6031_v25  ;;  %4906 = vmatprep.subr.bf16.mxu0 %v4905_v18  ;;  %v3150_v38 = vand.u32 4294901760, %v3149_v5  ;;  %v3161_v33 = vsub.f32 %v3159_v6, %v3160_v30  ;;  %v3693_v26 = vand.u32 4294901760, %v3692_v32  ;;  %v3156_v11 = vand.u32 4294901760, %v3155_v19 }
 0x34c   :  { %4954 = vmatprep.subr.bf16.mxu1 %v4953_v55  ;;  %v3704_v63 = vsub.f32 %v3702_v45, %v3703_v40  ;;  %v3167_v47 = vsub.f32 %v6021_v39, %v3166_v34  ;;  %v3699_v31 = vand.u32 4294901760, %v3698_v17  ;;  %v3710_v61 = vsub.f32 %v6027_v9, %v3709_v35 }
 0x34d   :  { %3116 = vmatmul.mubr.f32.vlgmr.msra.gmra.mrb[14].mxu0 %v3115_v43  ;;  %v3162_v42 = vand.u32 4294901760, %v3161_v33  ;;  %v4917_v57 = vpack.c.bf16 %v3159_v6, %v6013_v29  ;;  %v4965_v3 = vpack.c.bf16 %v3702_v45, %v6015_v60  ;;  %v4919_v18 = vpack.c.bf16 %v6021_v39, %v6005_v44  ;;  %v5182_v39 = vld [vmem:[%s6243_s11 + $0xe0] sm:$0xff]  }
 0x34e   :  { %3659 = vmatmul.mubr.f32.vlgmr.msra.gmra.mrb[34].mxu1 %v3115_v43  ;;  %4908 = vmatpush1.bf16.msra.mxu0 %v5984_v54  ;;  %v3705_v5 = vand.u32 4294901760, %v3704_v63  ;;  %v3168_v55 = vand.u32 4294901760, %v3167_v47  ;;  %v3711_v32 = vand.u32 4294901760, %v3710_v61  ;;  %v4967_v19 = vpack.c.bf16 %v6027_v9, %v6007_v49  ;;  %v5177_v49 = vld [vmem:[%s6243_s11 + $0x88] sm:$0xff]  }
 0x34f   :  { %4956 = vmatpush1.bf16.msra.mxu1 %v5986_v15  ;;  %v4909_v17 = vpack.c.bf16 %v3162_v42, %v3150_v38  ;;  %3226 = vmatprep.mubr.f32.mxu0 %v5254_v2  ;;  %v4933_v29 = vpack.c.bf16 %v3160_v30, %v3148_v13  ;;  %v4981_v6 = vpack.c.bf16 %v3703_v40, %v3691_v21  ;;  %v5180_v13 = vld [vmem:[%s6243_s11 + $0xd8] sm:$0xff]   ;;  %v5185_v9 = vld [vmem:[%s6243_s11 + $0xa8] sm:$0xff]  }
 0x350   :  { %v4957_v60 = vpack.c.bf16 %v3705_v5, %v3693_v26  ;;  %v4911_v45 = vpack.c.bf16 %v3168_v55, %v3156_v11  ;;  %v4959_v33 = vpack.c.bf16 %v3711_v32, %v3699_v31  ;;  %3769 = vmatprep.mubr.f32.mxu1 %v5254_v2  ;;  %v4935_v43 = vpack.c.bf16 %v3166_v34, %v3154_v22  ;;  %v5178_v22 = vld [vmem:[%s6243_s11 + $0xd0] sm:$0xff]   ;;  %v5181_v21 = vld [vmem:[%s6243_s11 + $0x98] sm:$0xff]  }
 0x351   :  { %4910 = vmatprep.subr.bf16.mxu0 %v4909_v17  ;;  %v4983_v54 = vpack.c.bf16 %v3709_v35, %v3697_v10  ;;  %v5179_v10 = vld [vmem:[%s6243_s11 + $0x90] sm:$0xff]   ;;  %v5188_v30 = vld [vmem:[%s6243_s11 + $0xf8] sm:$0xff]  }
 0x352   :  { %4958 = vmatprep.subr.bf16.mxu1 %v4957_v60  ;;  %4912 = vmatpush1.bf16.msra.mxu0 %v4911_v45  ;;  %v5189_v40 = vld [vmem:[%s6243_s11 + $0xb8] sm:$0xff]  }
 0x353   :  { %4960 = vmatpush1.bf16.msra.mxu1 %v4959_v33  ;;  %4914 = vmatprep.subr.bf16.mxu0 %v4913_v48  ;;  %v5172_v48 = vld [vmem:[%s6243_s11 + $0x78] sm:$0xff]  }
 0x354   :  { %4962 = vmatprep.subr.bf16.mxu1 %v4961_v8  ;;  %v5173_v8 = vld [vmem:[%s6243_s11 + $0x38] sm:$0xff]  }
 0x355   :  { %4540 = vmatmul.mubr.msk.f32.vlgmr.msra.gmra.mrb[14].mxu0 %vm56_vm3, %v5924_v59 }
 0x356   :  { %4543 = vmatmul.mubr.msk.f32.vlgmr.msra.gmra.mrb[34].mxu1 %vm56_vm3, %v5924_v59  ;;  %4916 = vmatpush1.bf16.msra.mxu0 %v4915_v36  ;;  %v5174_v36 = vld [vmem:[%s6243_s11 + $0xc0] sm:$0xff]  }
 0x357   :  { %4964 = vmatpush1.bf16.msra.mxu1 %v4963_v46  ;;  %4918 = vmatprep.subr.bf16.mxu0 %v4917_v57 }
 0x358   :  { %4966 = vmatprep.subr.bf16.mxu1 %v4965_v3  ;;  %3314 = vmatprep.mubr.f32.mxu0 %v5254_v2 }
 0x359   :  { %3857 = vmatprep.mubr.f32.mxu1 %v5254_v2 }
 0x35a   :  { %4920 = vmatpush1.bf16.msra.mxu0 %v4919_v18 }
 0x35b   :  { %4968 = vmatpush1.bf16.msra.mxu1 %v4967_v19  ;;  %4922 = vmatprep.subr.bf16.mxu0 %v5942_v62 }
 0x35c   :  { %4970 = vmatprep.subr.bf16.mxu1 %v5946_v12 }
 0x35d   :  { %3317 = vmatmul.mubr.f32.vlgmr.msra.gmra.mrb[14].mxu0 %v5982_v4 }
 0x35e   :  { %3860 = vmatmul.mubr.f32.vlgmr.msra.gmra.mrb[34].mxu1 %v5982_v4  ;;  %4924 = vmatpush1.bf16.msra.mxu0 %v5950_v28  ;;  %v5175_v4 = vld [vmem:[%s6243_s11 + $0x80] sm:$0xff]  }
 0x35f   :  { %4972 = vmatpush1.bf16.msra.mxu1 %v5952_v14  ;;  %4926 = vmatprep.subr.bf16.mxu0 %v6023_v7 }
 0x360   :  { %4974 = vmatprep.subr.bf16.mxu1 %v6029_v27  ;;  %3395 = vmatprep.mubr.f32.mxu0 %v5254_v2 }
 0x361   :  { %3938 = vmatprep.mubr.f32.mxu1 %v5254_v2 }
 0x362   :  { %4928 = vmatpush1.bf16.msra.mxu0 %v6025_v52 }
 0x363   :  { %4976 = vmatpush1.bf16.msra.mxu1 %v6031_v25  ;;  %4930 = vmatprep.subr.bf16.mxu0 %v5974_v23 }
 0x364   :  { %4978 = vmatprep.subr.bf16.mxu1 %v5976_v20 }
 0x365   :  { %3399 = vmatmul.mubr.f32.vlgmr.msra.gmra.mrb[14].mxu0 %v5989_v56 }
 0x366   :  { %3942 = vmatmul.mubr.f32.vlgmr.msra.gmra.mrb[34].mxu1 %v5989_v56  ;;  %4932 = vmatpush1.bf16.msra.mxu0 %v5978_v58  ;;  %v5176_v56 = vld [vmem:[%s6243_s11 + $0xc8] sm:$0xff]  }
 0x367   :  { %4980 = vmatpush1.bf16.msra.mxu1 %v5980_v51  ;;  %4934 = vmatprep.subr.bf16.mxu0 %v4933_v29 }
 0x368   :  { %4982 = vmatprep.subr.bf16.mxu1 %v4981_v6  ;;  %3493 = vmatprep.mubr.f32.mxu0 %v5254_v2 }
 0x369   :  { %4036 = vmatprep.mubr.f32.mxu1 %v5254_v2 }
 0x36a   :  { %4936 = vmatpush1.bf16.msra.mxu0 %v4935_v43 }
 0x36b   :  { %4984 = vmatpush1.bf16.msra.mxu1 %v4983_v54  ;;  %4938 = vmatprep.subr.bf16.mxu0 %v5942_v62  ;;  %v5166_v62 = vld [vmem:[%s6243_s11 + $0x60] sm:$0xff]  }
 0x36c   :  { %4986 = vmatprep.subr.bf16.mxu1 %v5946_v12  ;;  %v5168_v12 = vld [vmem:[%s6243_s11 + $0x68] sm:$0xff]  }
 0x36d   :  { %4541 = vmatmul.mubr.msk.f32.vlgmr.msra.gmra.mrb[14].mxu0 %vm56_vm3, %v5924_v59 }
 0x36e   :  { %4544 = vmatmul.mubr.msk.f32.vlgmr.msra.gmra.mrb[34].mxu1 %vm56_vm3, %v5924_v59  ;;  %4940 = vmatpush1.bf16.msra.mxu0 %v5950_v28  ;;  %v5170_v28 = vld [vmem:[%s6243_s11 + $0x70] sm:$0xff]  }
 0x36f   :  { %4988 = vmatpush1.bf16.msra.mxu1 %v5952_v14  ;;  %4942 = vmatprep.subr.bf16.mxu0 %v6023_v7  ;;  %v5171_v14 = vld [vmem:[%s6243_s11 + $0x30] sm:$0xff]   ;;  %v5183_v7 = vld [vmem:[%s6243_s11 + $0xa0] sm:$0xff]  }
 0x370   :  { %4990 = vmatprep.subr.bf16.mxu1 %v6029_v27  ;;  %3573 = vmatprep.mubr.f32.mxu0 %v5254_v2  ;;  %v5186_v27 = vld [vmem:[%s6243_s11 + $0xf0] sm:$0xff]  }
 0x371   :  { %4116 = vmatprep.mubr.f32.mxu1 %v5254_v2  ;;  %v5161_v2 = vld [vmem:[%s6243_s11 + $0x8] sm:$0xff]  }
 0x372   :  { %4944 = vmatpush1.bf16.msra.mxu0 %v6025_v52  ;;  %v5184_v52 = vld [vmem:[%s6243_s11 + $0xe8] sm:$0xff]  }
 0x373   :  { %4992 = vmatpush1.bf16.msra.mxu1 %v6031_v25  ;;  %4645 = vmatprep.subr.bf16.mxu0 %v5158_v0  ;;  %v5187_v25 = vld [vmem:[%s6243_s11 + $0xb0] sm:$0xff]  }
 0x375   :  { %4542 = vmatmul.mubr.msk.f32.vlgmr.msra.gmra.mrb[14].mxu0 %vm56_vm3, %v5924_v59 }
 0x376   :  { %4545 = vmatmul.mubr.msk.f32.vlgmr.msra.gmra.mrb[34].mxu1 %vm56_vm3, %v5924_v59  ;;  %4646 = vmatpush3.bf16.msra.mxu0 %v5159_v1  ;;  %v5164_v59 = vld [vmem:[%s6243_s11 + $0x58] sm:$0xff]  }
 0x377   :  { %4647 = vmatprep.subr.bf16.mxu0 %v5160_v50 }
 0x37a   :  { %4648 = vmatpush3.bf16.msra.mxu0 %v5161_v2 }
 0x37b   :  { %4649 = vmatprep.subr.bf16.mxu0 %v5162_v53 }
 0x37e   :  { %4650 = vmatpush3.bf16.msra.mxu0 %v5163_v24 }
 0x37f   :  { %4651 = vmatprep.subr.bf16.mxu0 %v5164_v59 }
 0x382   :  { %4652 = vmatpush3.bf16.msra.mxu0 %v5165_v37 }
 0x383   :  { %4653 = vmatprep.subr.bf16.mxu0 %v5166_v62 }
 0x386   :  { %4654 = vmatpush3.bf16.msra.mxu0 %v5167_v41 }
 0x387   :  { %4655 = vmatprep.subr.bf16.mxu0 %v5168_v12 }
 0x38a   :  { %4656 = vmatpush3.bf16.msra.mxu0 %v5169_v16 }
 0x38b   :  { %4657 = vmatprep.subr.bf16.mxu0 %v5170_v28 }
 0x38e   :  { %4658 = vmatpush3.bf16.msra.mxu0 %v5171_v14 }
 0x38f   :  { %4659 = vmatprep.subr.bf16.mxu0 %v5172_v48 }
 0x392   :  { %4660 = vmatpush3.bf16.msra.mxu0 %v5173_v8 }
 0x393   :  { %4667 = vmatprep.subr.bf16.mxu0 %v5174_v36 }
 0x448   :  { %v3576_v46 = vpop.f32.mrb[14].mxu0 }
 0x449   :  { %v4119_v23 = vpop.f32.mrb[34].mxu1  ;;  %v3578_v20 = vpop.f32.mrb[15].mxu0  ;;  %v4139_v15 = vpack.c.bf16 %v3576_v46, %v3576_v46 }
 0x44a   :  { %v4140_v58 = vpack.c.bf16 %v3578_v20, %v3578_v20  ;;  %v4121_v51 = vpop.f32.mrb[35].mxu1  ;;  %v4141_v34 = vpack.c.bf16 %v4119_v23, %v4119_v23 }
 0x44b   :  { %v4142_v44 = vpack.c.bf16 %v4121_v51, %v4121_v51 }
 0x44c   :  { %4431 = vmatprep.mubr.bf16.mxu0 %v4140_v58 }
 0x44d   :  { %4432 = vmatmul.mubr.bf16.vlgmr.msra.gmra.mrb[16].mxu0 %v4139_v15 }
 0x44e   :  { %4668 = vmatpush3.bf16.msra.mxu0 %v5175_v4  ;;  %4471 = vmatprep.mubr.bf16.mxu0 %v4142_v44 }
 0x44f   :  { %4669 = vmatprep.subr.bf16.mxu0 %v5176_v56 }
 0x452   :  { %4670 = vmatpush3.bf16.msra.mxu0 %v5177_v49 }
 0x453   :  { %4671 = vmatprep.subr.bf16.mxu0 %v5178_v22 }
 0x456   :  { %4672 = vmatpush3.bf16.msra.mxu0 %v5179_v10 }
 0x457   :  { %4673 = vmatprep.subr.bf16.mxu0 %v5180_v13 }
 0x45a   :  { %4674 = vmatpush3.bf16.msra.mxu0 %v5181_v21 }
 0x45b   :  { %4675 = vmatprep.subr.bf16.mxu0 %v5182_v39 }
 0x45e   :  { %4676 = vmatpush3.bf16.msra.mxu0 %v5183_v7 }
 0x45f   :  { %4677 = vmatprep.subr.bf16.mxu0 %v5184_v52 }
 0x462   :  { %4678 = vmatpush3.bf16.msra.mxu0 %v5185_v9 }
 0x463   :  { %4679 = vmatprep.subr.bf16.mxu0 %v5186_v27 }
 0x466   :  { %4680 = vmatpush3.bf16.msra.mxu0 %v5187_v25 }
 0x467   :  { %4681 = vmatprep.subr.bf16.mxu0 %v5188_v30 }
 0x46a   :  { %4682 = vmatpush3.bf16.msra.mxu0 %v5189_v40 }
 0x46d   :  { %4472 = vmatmul.mubr.bf16.vlgmr.msra.gmra.mrb[20].mxu0 %v4141_v34 }
 0x46e   :  { %5217 = shalt.err (!%p5214_p4)
}
 0x46f   :  { %s5218_s2 = scalar_lea.hbm %s6245_s13, 128 }
 0x470   :  { %p5219_p5 = scmp.ne.s32.totalorder %s6245_s13, %s5218_s2  ;;  %p5222_p6 = scmp.lt.u32.totalorder %s5218_s2, %s6245_s13 }
 0x472   :  { %p5224_p7 = pnand %p5222_p6, %p5219_p5 }
 0x474   :  { %5227 = shalt.err (!%p5224_p7)
}
 0x475   :  { %4500 = dma.vmem_to_hbm [thread:$0]  %s4498_s5, 128, %s6245_s13, [#allocation7]  }
 0x476   :  { %s5262_s20 = smov [#allocation4]  }
 0x477   :  { %s4487_s0 = sshll.u32 %s5262_s20, 4  ;;  %s4488_s0 = int_to_ptr.vmem [resolvable:$true] %s4487_s0 }
 0x478   :  { %s5228_s8 = scalar_lea.vmem %s4488_s0, 128  ;;  %p5233_p9 = scmp.lt.s32.totalorder %s4488_s0, %s4488_s0 }
 0x479   :  { %p5229_p8 = scmp.ne.s32.totalorder %s4488_s0, %s5228_s8  ;;  %p5234_p10 = scmp.lt.s32.totalorder %s5228_s8, %s5228_s8 }
 0x47b   :  { %p5235_p11 = por %p5234_p10, %p5233_p9 }
 0x47d   :  { %p5236_p12 = pnand %p5235_p11, %p5229_p8 }
 0x520   :  { %v4661_v35 = vpop.f32.mrb[16].mxu0 }
 0x521   :  { %v4662_v38 = vpop.f32.mrb[17].mxu0 }
 0x522   :  { %v4663_v26 = vadd.f32 %v4662_v38, %v4661_v35  ;;  %v4664_v11 = vpop.f32.mrb[18].mxu0 }
 0x523   :  { %v4665_v63 = vpop.f32.mrb[19].mxu0 }
 0x540   :  { %v4683_v47 = vpop.f32.mrb[20].mxu0 }
 0x541   :  { %v4684_v31 = vpop.f32.mrb[21].mxu0 }
 0x542   :  { %v4685_v61 = vadd.f32 %v4684_v31, %v4683_v47  ;;  %v4686_v42 = vpop.f32.mrb[22].mxu0 }
 0x543   :  { %v4687_v57 = vpop.f32.mrb[23].mxu0 }
 0x544   :  { %v4474_v3 = vadd.f32 %v4685_v61, %v4663_v26 }
 0x546   :  { %v4479_v18 = vmul.f32 0.25, %v4474_v3 }
 0x548   :  { %4480 = vst.msk [vmem:[#allocation4] sm:$0xff] %vm56_vm3, %v4479_v18 }
 0x549   :  { %5239 = shalt.err (!%p5236_p12)
}
 0x54a   :  { %s5240_s22 = scalar_lea.hbm %s6244_s12, 128 }
 0x54b   :  { %p5241_p13 = scmp.ne.s32.totalorder %s6244_s12, %s5240_s22  ;;  %p5244_p0 = scmp.lt.u32.totalorder %s5240_s22, %s6244_s12 }
 0x54d   :  { %p5246_p1 = pnand %p5244_p0, %p5241_p13 }
 0x54f   :  { %5249 = shalt.err (!%p5246_p1)
}
 0x550   :  { %4490 = dma.vmem_to_hbm [thread:$0]  %s4488_s0, 128, %s6244_s12, [#allocation5]  }
 0x551   :  { %5250 = dma.done.wait [#allocation5], 128  }
 0x552   :  { %5251 = vsyncadd [#allocation5], 4294967168 }
 0x553   :  { %5252 = dma.done.wait [#allocation7], 128  }
 0x554   :  { %5253 = vsyncadd [#allocation7], 4294967168 }
 0x555   :  { %4507 = vsyncpa [#allocation5], 1 }
 0x556   :  { %4508 = vsyncpa [#allocation7], 1 }

</bundles_post_ra>
